<compile_context>
chip_gen: v7x
topology: tpu7x:2x2x1
jax: 0.10.0
libtpu: 0.0.40
codegen_flags: <defaults>
</compile_context>

<pallas_src>
import jax
import jax.numpy as jnp
from jax.experimental import pallas as pl
from jax.experimental.pallas import tpu as pltpu

_BN_EPS = 1e-5   # PyTorch BatchNorm2d default eps
_LANE = 128      # TPU lane width; channel dims padded to this


def _round_up(x, m):
    return (x + m - 1) // m * m


def _pad_last(x, target):
    pad = target - x.shape[-1]
    if pad == 0:
        return x
    return jnp.pad(x, [(0, 0)] * (x.ndim - 1) + [(0, pad)])


# ---------------------------------------------------------------------------
# Kernel 1: tiled matmul + bias  (ConvTranspose2d(k=2, s=2) as a matmul)
# ---------------------------------------------------------------------------
def _matmul_bias_kernel(x_ref, w_ref, b_ref, o_ref):
    o_ref[...] = (
        jnp.dot(x_ref[...], w_ref[...], preferred_element_type=jnp.float32)
        + b_ref[...]
    )


def _tiled_matmul_bias(x2d, w2d, b_row, *, tile_m=256):
    """x2d (M, K) bf16 @ w2d (K, Np) bf16 + b_row (1, Np) f32 -> (M, Np) f32."""
    M, K = x2d.shape
    Np = w2d.shape[1]
    m_pad = _round_up(max(M, tile_m), tile_m)
    if m_pad != M:
        x2d = jnp.pad(x2d, ((0, m_pad - M), (0, 0)))
    out = pl.pallas_call(
        _matmul_bias_kernel,
        out_shape=jax.ShapeDtypeStruct((m_pad, Np), jnp.float32),
        grid=(m_pad // tile_m,),
        in_specs=[
            pl.BlockSpec((tile_m, K), lambda i: (i, 0)),   # activation tiles (pipelined)
            pl.BlockSpec((K, Np), lambda i: (0, 0)),       # weight resident
            pl.BlockSpec((1, Np), lambda i: (0, 0)),       # bias resident
        ],
        out_specs=pl.BlockSpec((tile_m, Np), lambda i: (i, 0)),
        compiler_params=pltpu.CompilerParams(
            dimension_semantics=("parallel",),
            vmem_limit_bytes=32 * 1024 * 1024,
        ),
        cost_estimate=pl.CostEstimate(
            flops=2 * m_pad * K * Np,
            transcendentals=0,
            bytes_accessed=m_pad * K * 2 + K * Np * 2 + m_pad * Np * 4,
        ),
    )(x2d, w2d, b_row)
    return out[:M]


# ---------------------------------------------------------------------------
# Kernel 2: 3x3 conv (halo-free, per output row) + per-row BN partial stats
# ---------------------------------------------------------------------------
def _conv3x3_stats_kernel(x0_ref, x1_ref, x2_ref, w_ref, b_ref,
                          y_ref, s_ref, q_ref):
    # x*_ref : (1, 1, W+2, Cin_p) bf16  -- three vertically adjacent padded rows
    # w_ref  : (3, 3, Cin_p, Cout_p) bf16 (resident)
    # b_ref  : (1, Cout_p) f32           (resident)
    # y_ref  : (1, 1, W, Cout_p) f32     pre-BN conv output row
    # s_ref  : (1, 1, 1, Cout_p) f32     per-row channel sum       (f32 accumulation)
    # q_ref  : (1, 1, 1, Cout_p) f32     per-row channel sum of squares
    w_out = y_ref.shape[2]
    cout = y_ref.shape[3]
    acc = jnp.broadcast_to(b_ref[...], (w_out, cout)).astype(jnp.float32)
    rows = (x0_ref[0, 0], x1_ref[0, 0], x2_ref[0, 0])
    for kh in range(3):
        row = rows[kh]
        for kw in range(3):
            acc = acc + jnp.dot(
                row[kw:kw + w_out, :], w_ref[kh, kw],
                preferred_element_type=jnp.float32)
    y_ref[0, 0] = acc
    s_ref[0, 0] = jnp.sum(acc, axis=0, keepdims=True)
    q_ref[0, 0] = jnp.sum(acc * acc, axis=0, keepdims=True)


def _conv3x3_stats(x_pad, w4, b_row):
    """x_pad (N, H+2, W+2, Cin_p) bf16, w4 (3,3,Cin_p,Cout_p) bf16, b_row (1,Cout_p) f32."""
    N, Hp2, Wp2, Cin_p = x_pad.shape
    H, W = Hp2 - 2, Wp2 - 2
    Cout_p = w4.shape[-1]

    def in_map(kh):
        return lambda n, h: (n, h + kh, 0, 0)   # block size 1 on H => element index

    y, s, q = pl.pallas_call(
        _conv3x3_stats_kernel,
        out_shape=(
            jax.ShapeDtypeStruct((N, H, W, Cout_p), jnp.float32),
            jax.ShapeDtypeStruct((N, H, 1, Cout_p), jnp.float32),
            jax.ShapeDtypeStruct((N, H, 1, Cout_p), jnp.float32),
        ),
        grid=(N, H),
        in_specs=[
            pl.BlockSpec((1, 1, Wp2, Cin_p), in_map(0)),
            pl.BlockSpec((1, 1, Wp2, Cin_p), in_map(1)),
            pl.BlockSpec((1, 1, Wp2, Cin_p), in_map(2)),
            pl.BlockSpec((3, 3, Cin_p, Cout_p), lambda n, h: (0, 0, 0, 0)),
            pl.BlockSpec((1, Cout_p), lambda n, h: (0, 0)),
        ],
        out_specs=(
            pl.BlockSpec((1, 1, W, Cout_p), lambda n, h: (n, h, 0, 0)),
            pl.BlockSpec((1, 1, 1, Cout_p), lambda n, h: (n, h, 0, 0)),
            pl.BlockSpec((1, 1, 1, Cout_p), lambda n, h: (n, h, 0, 0)),
        ),
        compiler_params=pltpu.CompilerParams(
            dimension_semantics=("parallel", "parallel"),
            vmem_limit_bytes=32 * 1024 * 1024,
        ),
        cost_estimate=pl.CostEstimate(
            flops=2 * N * H * W * 9 * Cin_p * Cout_p,
            transcendentals=0,
            bytes_accessed=(3 * N * H * Wp2 * Cin_p * 2
                            + 9 * Cin_p * Cout_p * 2
                            + N * H * W * Cout_p * 4),
        ),
    )(x_pad, x_pad, x_pad, w4, b_row)
    return y, s, q


# ---------------------------------------------------------------------------
# Kernel 3: BN apply (scale/shift) + ReLU, writing the zero-padded layout the
#           next 3x3 conv consumes (saves the XLA pad round trip).
# ---------------------------------------------------------------------------
def _bn_relu_pad_kernel(y_ref, sc_ref, sh_ref, o_ref):
    # y_ref (1,1,W,Cp) f32 ; sc/sh (1,Cp) f32 ; o_ref (1,1,W+2,Cp) out_dtype
    hp = pl.program_id(1)
    h_total = pl.num_programs(1)          # H + 2
    w_out = y_ref.shape[2]
    o_ref[...] = jnp.zeros(o_ref.shape, o_ref.dtype)   # borders stay zero

    @pl.when(jnp.logical_and(hp > 0, hp < h_total - 1))
    def _():
        v = jnp.maximum(y_ref[0, 0] * sc_ref[...] + sh_ref[...], 0.0)
        o_ref[0, 0, 1:w_out + 1, :] = v.astype(o_ref.dtype)


def _bn_relu_pad(y, scale_row, shift_row, out_dtype):
    N, H, W, Cp = y.shape
    return pl.pallas_call(
        _bn_relu_pad_kernel,
        out_shape=jax.ShapeDtypeStruct((N, H + 2, W + 2, Cp), out_dtype),
        grid=(N, H + 2),
        in_specs=[
            pl.BlockSpec((1, 1, W, Cp),
                         lambda n, hp: (n, jnp.clip(hp - 1, 0, H - 1), 0, 0)),
            pl.BlockSpec((1, Cp), lambda n, hp: (0, 0)),
            pl.BlockSpec((1, Cp), lambda n, hp: (0, 0)),
        ],
        out_specs=pl.BlockSpec((1, 1, W + 2, Cp), lambda n, hp: (n, hp, 0, 0)),
        compiler_params=pltpu.CompilerParams(
            dimension_semantics=("parallel", "parallel"),
            vmem_limit_bytes=32 * 1024 * 1024,
        ),
    )(y, scale_row, shift_row)


# ---------------------------------------------------------------------------
# Layer wrappers (XLA glue is layout / tiny reductions only)
# ---------------------------------------------------------------------------
def conv_transpose_2x2_s2(x_nhwc, w, b):
    """nn.ConvTranspose2d(Cin, Cout, kernel_size=2, stride=2). w: (Cin,Cout,2,2)."""
    N, H, W, Cin = x_nhwc.shape
    Cout = w.shape[1]
    Cin_p = _round_up(Cin, _LANE)
    Np = _round_up(4 * Cout, _LANE)   # lane-dense matmul output

    w_flat = jnp.transpose(w, (0, 2, 3, 1)).reshape(Cin, 4 * Cout)   # (ci, (a,b,co))
    w_flat = jnp.pad(w_flat, ((0, Cin_p - Cin), (0, Np - 4 * Cout))).astype(jnp.bfloat16)
    b_flat = jnp.pad(jnp.tile(b, 4), (0, Np - 4 * Cout)).reshape(1, Np).astype(jnp.float32)

    x2d = _pad_last(x_nhwc.reshape(N * H * W, Cin), Cin_p).astype(jnp.bfloat16)
    y = _tiled_matmul_bias(x2d, w_flat, b_flat)[:, :4 * Cout]
    # TODO(synk): pixel-shuffle layout kept as XLA reshape/transpose (pure layout op).
    y = y.reshape(N, H, W, 2, 2, Cout)
    y = jnp.transpose(y, (0, 1, 3, 2, 4, 5)).reshape(N, 2 * H, 2 * W, Cout)
    return y


def _interp_matrix(out_size, in_size):
    if out_size == 1:
        src = jnp.zeros((1,), jnp.float32)
    else:
        src = jnp.arange(out_size, dtype=jnp.float32) * ((in_size - 1) / (out_size - 1))
    lo = jnp.clip(jnp.floor(src).astype(jnp.int32), 0, in_size - 1)
    hi = jnp.clip(lo + 1, 0, in_size - 1)
    frac = src - lo.astype(jnp.float32)
    return (jax.nn.one_hot(lo, in_size, dtype=jnp.float32) * (1.0 - frac)[:, None]
            + jax.nn.one_hot(hi, in_size, dtype=jnp.float32) * frac[:, None])


def bilinear_align_corners(x_nhwc, out_h, out_w):
    """F.interpolate(bilinear, align_corners=True) expressed as two small matmuls."""
    N, H, W, C = x_nhwc.shape
    if (out_h, out_w) == (H, W):
        return x_nhwc
    a_h = _interp_matrix(out_h, H)
    a_w = _interp_matrix(out_w, W)
    # TODO(synk): these interpolation matmuls stay in XLA (MXU via dot), not Pallas.
    y = jnp.einsum("ph,nhwc->npwc", a_h, x_nhwc, precision=jax.lax.Precision.HIGHEST)
    y = jnp.einsum("qw,npwc->npqc", a_w, y, precision=jax.lax.Precision.HIGHEST)
    return y


def _bn_scale_shift(s, q, count, gamma_p, beta_p):
    total = jnp.sum(s, axis=(0, 1, 2))
    total_sq = jnp.sum(q, axis=(0, 1, 2))
    mean = total / count
    var = jnp.maximum(total_sq / count - mean * mean, 0.0)   # biased var, f32, clamped
    scale = gamma_p * jax.lax.rsqrt(var + _BN_EPS)
    shift = beta_p - mean * scale
    return scale.reshape(1, -1), shift.reshape(1, -1)


def conv_bn_relu_block(x_pad_bf16, w_t, b_t, gamma, beta, count, out_dtype):
    """Conv3x3(pad=1) -> BatchNorm2d(train stats) -> ReLU.

    x_pad_bf16: (N, H+2, W+2, Cin_p) bf16, spatially zero-padded, channel-padded.
    Returns (N, H+2, W+2, Cout_p) in out_dtype, zero-padded for the next conv.
    """
    Cout, Cin = w_t.shape[0], w_t.shape[1]
    Cin_p = x_pad_bf16.shape[-1]
    Cout_p = _round_up(Cout, _LANE)

    w4 = jnp.transpose(w_t, (2, 3, 1, 0))   # (kh, kw, cin, cout)
    w4 = jnp.pad(w4, ((0, 0), (0, 0), (0, Cin_p - Cin), (0, Cout_p - Cout))).astype(jnp.bfloat16)
    b_row = jnp.pad(b_t, (0, Cout_p - Cout)).reshape(1, Cout_p).astype(jnp.float32)
    gamma_p = jnp.pad(gamma, (0, Cout_p - Cout)).astype(jnp.float32)
    beta_p = jnp.pad(beta, (0, Cout_p - Cout)).astype(jnp.float32)

    y, s, q = _conv3x3_stats(x_pad_bf16, w4, b_row)             # pass 1 (matmul + stats)
    scale, shift = _bn_scale_shift(s, q, count, gamma_p, beta_p)  # tiny XLA reduction
    return _bn_relu_pad(y, scale, shift, out_dtype)              # pass 2 (apply + relu + pad)


# ---------------------------------------------------------------------------
# Decoder module: params + forward
# ---------------------------------------------------------------------------
def init_decoder_params(key, in_channels, out_channels):
    ks = jax.random.split(key, 8)
    return {
        "up_w": 0.1 * jax.random.normal(ks[0], (in_channels, out_channels, 2, 2), jnp.float32),
        "up_b": 0.1 * jax.random.normal(ks[1], (out_channels,), jnp.float32),
        "c1_w": 0.1 * jax.random.normal(ks[2], (out_channels, 2 * out_channels, 3, 3), jnp.float32),
        "c1_b": 0.1 * jax.random.normal(ks[3], (out_channels,), jnp.float32),
        "bn1_g": 1.0 + 0.05 * jax.random.normal(ks[4], (out_channels,), jnp.float32),
        "bn1_b": 0.05 * jax.random.normal(ks[5], (out_channels,), jnp.float32),
        "c2_w": 0.1 * jax.random.normal(ks[6], (out_channels, out_channels, 3, 3), jnp.float32),
        "c2_b": 0.1 * jax.random.normal(ks[7], (out_channels,), jnp.float32),
        "bn2_g": jnp.ones((out_channels,), jnp.float32),
        "bn2_b": jnp.zeros((out_channels,), jnp.float32),
    }


@jax.jit
def decoder_forward(params, x_nchw, skip_nchw):
    x = jnp.transpose(x_nchw, (0, 2, 3, 1)).astype(jnp.float32)       # NCHW -> NHWC
    skip = jnp.transpose(skip_nchw, (0, 2, 3, 1)).astype(jnp.float32)
    N, Hs, Ws, _ = skip.shape
    Cout = params["up_w"].shape[1]

    up = conv_transpose_2x2_s2(x, params["up_w"], params["up_b"])
    up = bilinear_align_corners(up, Hs, Ws)

    # TODO(synk): channel concat + halo pad kept as one XLA pad (single write).
    cat = jnp.concatenate([up, skip], axis=-1)                         # (N,Hs,Ws,2*Cout)
    Cin1_p = _round_up(2 * Cout, _LANE)
    x1 = jnp.pad(cat, ((0, 0), (1, 1), (1, 1), (0, Cin1_p - 2 * Cout))).astype(jnp.bfloat16)

    count = float(N * Hs * Ws)  # BN reduction domain (per channel)
    h1 = conv_bn_relu_block(x1, params["c1_w"], params["c1_b"],
                            params["bn1_g"], params["bn1_b"], count, jnp.bfloat16)
    h2 = conv_bn_relu_block(h1, params["c2_w"], params["c2_b"],
                            params["bn2_g"], params["bn2_b"], count, jnp.float32)

    out = h2[:, 1:Hs + 1, 1:Ws + 1, :Cout]                             # drop halo + channel pad
    return jnp.transpose(out, (0, 3, 1, 2))                            # back to NCHW


# ---------------------------------------------------------------------------
# Pure-JAX reference (for numerical sanity check)
# ---------------------------------------------------------------------------
def _reference_forward(params, x_nchw, skip_nchw):
    x = jnp.transpose(x_nchw, (0, 2, 3, 1)).astype(jnp.float32)
    skip = jnp.transpose(skip_nchw, (0, 2, 3, 1)).astype(jnp.float32)
    N, H, W, _ = x.shape
    Hs, Ws = skip.shape[1], skip.shape[2]
    Cout = params["up_w"].shape[1]

    z = jnp.einsum("nijc,cdab->nijabd", x, params["up_w"],
                   precision=jax.lax.Precision.HIGHEST)
    z = jnp.transpose(z, (0, 1, 3, 2, 4, 5)).reshape(N, 2 * H, 2 * W, Cout) + params["up_b"]

    def coords(out_size, in_size):
        if out_size == 1:
            src = jnp.zeros((1,), jnp.float32)
        else:
            src = jnp.arange(out_size, dtype=jnp.float32) * ((in_size - 1) / (out_size - 1))
        lo = jnp.clip(jnp.floor(src).astype(jnp.int32), 0, in_size - 1)
        hi = jnp.clip(lo + 1, 0, in_size - 1)
        return lo, hi, src - lo.astype(jnp.float32)

    h0, h1, fh = coords(Hs, 2 * H)
    w0, w1, fw = coords(Ws, 2 * W)
    zh = z[:, h0] * (1 - fh)[None, :, None, None] + z[:, h1] * fh[None, :, None, None]
    zr = zh[:, :, w0] * (1 - fw)[None, None, :, None] + zh[:, :, w1] * fw[None, None, :, None]

    def conv_bn_relu(inp, w_t, b_t, g, beta):
        rhs = jnp.transpose(w_t, (2, 3, 1, 0))
        y = jax.lax.conv_general_dilated(
            inp, rhs, (1, 1), "SAME",
            dimension_numbers=("NHWC", "HWIO", "NHWC"),
            precision=jax.lax.Precision.HIGHEST) + b_t
        mean = jnp.mean(y, axis=(0, 1, 2))
        var = jnp.mean((y - mean) ** 2, axis=(0, 1, 2))
        y = (y - mean) * jax.lax.rsqrt(var + _BN_EPS) * g + beta
        return jnp.maximum(y, 0.0)

    t = jnp.concatenate([zr, skip], axis=-1)
    t = conv_bn_relu(t, params["c1_w"], params["c1_b"], params["bn1_g"], params["bn1_b"])
    t = conv_bn_relu(t, params["c2_w"], params["c2_b"], params["bn2_g"], params["bn2_b"])
    return jnp.transpose(t, (0, 3, 1, 2))


if __name__ == "__main__":
    key = jax.random.PRNGKey(0)
    k_p, k_x, k_s = jax.random.split(key, 3)

    in_channels, out_channels = 8, 4
    x = jax.random.normal(k_x, (2, in_channels, 7, 7), jnp.float32)        # NCHW
    skip = jax.random.normal(k_s, (2, out_channels, 16, 16), jnp.float32)  # NCHW

    params = init_decoder_params(k_p, in_channels, out_channels)
    out = decoder_forward(params, x, skip)
    jax.block_until_ready(out)

    assert out.shape == (2, out_channels, 16, 16), out.shape
    assert bool(jnp.all(jnp.isfinite(out)))

    ref = _reference_forward(params, x, skip)
    err = float(jnp.max(jnp.abs(out - ref)))
    assert err < 0.1, f"max abs error vs reference: {err}"

    print("KERNEL_OK")
</pallas_src>

<mosaic_0001>
module attributes {stable_mosaic.version = 11 : i64} {
  func.func @_matmul_bias_kernel(%arg0: i32, %arg1: memref<256x128xbf16, #tpu.memory_space<vmem>>, %arg2: memref<128x128xbf16, #tpu.memory_space<vmem>>, %arg3: memref<1x128xf32, #tpu.memory_space<vmem>>, %arg4: memref<256x128xf32, #tpu.memory_space<vmem>>) attributes {dimension_semantics = [#tpu.dimension_semantics<parallel>], iteration_bounds = array<i64: 1>, scalar_prefetch = 0 : i64, scratch_operands = 0 : i64, tpu.core_type = #tpu.core_type<tc>, window_params = [{transform_indices = @transform_0, window_bounds = array<i64: 256, 128>}, {pipeline_mode = #tpu.pipeline_mode<synchronous>, transform_indices = @transform_1, window_bounds = array<i64: 128, 128>}, {pipeline_mode = #tpu.pipeline_mode<synchronous>, transform_indices = @transform_2, window_bounds = array<i64: 1, 128>}, {transform_indices = @transform_3, window_bounds = array<i64: 256, 128>}]} {
    %c0 = arith.constant 0 : index
    %c0_0 = arith.constant 0 : index
    %0 = vector.load %arg1[%c0, %c0_0] : memref<256x128xbf16, #tpu.memory_space<vmem>>, vector<256x128xbf16>
    %c0_1 = arith.constant 0 : index
    %c0_2 = arith.constant 0 : index
    %1 = vector.load %arg2[%c0_1, %c0_2] : memref<128x128xbf16, #tpu.memory_space<vmem>>, vector<128x128xbf16>
    %cst = arith.constant dense<0.000000e+00> : vector<256x128xf32>
    %2 = tpu.matmul %0, %1, %cst {dimension_numbers = #tpu.dot_dimension_numbers<[1], [0], [0], [1], [0, 0, 1, 1], [], []>} : vector<256x128xbf16>, vector<128x128xbf16>, vector<256x128xf32> -> vector<256x128xf32>
    %c0_3 = arith.constant 0 : index
    %c0_4 = arith.constant 0 : index
    %3 = vector.load %arg3[%c0_3, %c0_4] : memref<1x128xf32, #tpu.memory_space<vmem>>, vector<1x128xf32>
    %4 = vector.broadcast %3 : vector<1x128xf32> to vector<256x128xf32>
    %5 = arith.addf %2, %4 : vector<256x128xf32>
    %c0_5 = arith.constant 0 : index
    %c0_6 = arith.constant 0 : index
    %6 = vector.load %arg4[%c0_5, %c0_6] : memref<256x128xf32, #tpu.memory_space<vmem>>, vector<256x128xf32>
    tpu.vector_store %arg4[%c0_5, %c0_6], %5 {strides = array<i32>} : memref<256x128xf32, #tpu.memory_space<vmem>>, vector<256x128xf32>,
    return
  }
  func.func @transform_0(%arg0: i32) -> (i32, i32) {
    %c0_i32 = arith.constant 0 : i32
    %c0_i32_0 = arith.constant 0 : i32
    return %arg0, %c0_i32 : i32, i32
  }
  func.func @transform_1(%arg0: i32) -> (i32, i32) {
    %c0_i32 = arith.constant 0 : i32
    %c0_i32_0 = arith.constant 0 : i32
    %c0_i32_1 = arith.constant 0 : i32
    return %c0_i32, %c0_i32_0 : i32, i32
  }
  func.func @transform_2(%arg0: i32) -> (i32, i32) {
    %c0_i32 = arith.constant 0 : i32
    %c0_i32_0 = arith.constant 0 : i32
    %c0_i32_1 = arith.constant 0 : i32
    return %c0_i32, %c0_i32_0 : i32, i32
  }
  func.func @transform_3(%arg0: i32) -> (i32, i32) {
    %c0_i32 = arith.constant 0 : i32
    %c0_i32_0 = arith.constant 0 : i32
    return %arg0, %c0_i32 : i32, i32
  }
}

module attributes {stable_mosaic.version = 11 : i64} {
  func.func @_conv3x3_stats_kernel(%arg0: i32, %arg1: i32, %arg2: memref<1x1x18x128xbf16, #tpu.memory_space<vmem>>, %arg3: memref<1x1x18x128xbf16, #tpu.memory_space<vmem>>, %arg4: memref<1x1x18x128xbf16, #tpu.memory_space<vmem>>, %arg5: memref<3x3x128x128xbf16, #tpu.memory_space<vmem>>, %arg6: memref<1x128xf32, #tpu.memory_space<vmem>>, %arg7: memref<1x1x16x128xf32, #tpu.memory_space<vmem>>, %arg8: memref<1x1x1x128xf32, #tpu.memory_space<vmem>>, %arg9: memref<1x1x1x128xf32, #tpu.memory_space<vmem>>) attributes {dimension_semantics = [#tpu.dimension_semantics<parallel>, #tpu.dimension_semantics<parallel>], iteration_bounds = array<i64: 2, 16>, scalar_prefetch = 0 : i64, scratch_operands = 0 : i64, tpu.core_type = #tpu.core_type<tc>, window_params = [{transform_indices = @transform_0, window_bounds = array<i64: 1, 1, 18, 128>}, {transform_indices = @transform_1, window_bounds = array<i64: 1, 1, 18, 128>}, {transform_indices = @transform_2, window_bounds = array<i64: 1, 1, 18, 128>}, {pipeline_mode = #tpu.pipeline_mode<synchronous>, transform_indices = @transform_3, window_bounds = array<i64: 3, 3, 128, 128>}, {pipeline_mode = #tpu.pipeline_mode<synchronous>, transform_indices = @transform_4, window_bounds = array<i64: 1, 128>}, {transform_indices = @transform_5, window_bounds = array<i64: 1, 1, 16, 128>}, {transform_indices = @transform_6, window_bounds = array<i64: 1, 1, 1, 128>}, {transform_indices = @transform_7, window_bounds = array<i64: 1, 1, 1, 128>}]} {
    %c0 = arith.constant 0 : index
    %c0_0 = arith.constant 0 : index
    %0 = vector.load %arg6[%c0, %c0_0] : memref<1x128xf32, #tpu.memory_space<vmem>>, vector<1x128xf32>
    %1 = vector.shape_cast %0 : vector<1x128xf32> to vector<1x128xf32>
    %2 = vector.broadcast %1 : vector<1x128xf32> to vector<16x128xf32>
    %c0_1 = arith.constant 0 : index
    %c0_2 = arith.constant 0 : index
    %c0_3 = arith.constant 0 : index
    %c0_4 = arith.constant 0 : index
    %3 = vector.load %arg2[%c0_1, %c0_2, %c0_3, %c0_4] : memref<1x1x18x128xbf16, #tpu.memory_space<vmem>>, vector<1x1x18x128xbf16>
    %4 = vector.shape_cast %3 : vector<1x1x18x128xbf16> to vector<18x128xbf16>
    %c0_5 = arith.constant 0 : index
    %c0_6 = arith.constant 0 : index
    %c0_7 = arith.constant 0 : index
    %c0_8 = arith.constant 0 : index
    %5 = vector.load %arg3[%c0_5, %c0_6, %c0_7, %c0_8] : memref<1x1x18x128xbf16, #tpu.memory_space<vmem>>, vector<1x1x18x128xbf16>
    %6 = vector.shape_cast %5 : vector<1x1x18x128xbf16> to vector<18x128xbf16>
    %c0_9 = arith.constant 0 : index
    %c0_10 = arith.constant 0 : index
    %c0_11 = arith.constant 0 : index
    %c0_12 = arith.constant 0 : index
    %7 = vector.load %arg4[%c0_9, %c0_10, %c0_11, %c0_12] : memref<1x1x18x128xbf16, #tpu.memory_space<vmem>>, vector<1x1x18x128xbf16>
    %8 = vector.shape_cast %7 : vector<1x1x18x128xbf16> to vector<18x128xbf16>
    %9 = vector.extract_strided_slice %4 {offsets = [0, 0], sizes = [16, 128], strides = [1, 1]} : vector<18x128xbf16> to vector<16x128xbf16>
    %c0_13 = arith.constant 0 : index
    %c0_14 = arith.constant 0 : index
    %c0_15 = arith.constant 0 : index
    %c0_16 = arith.constant 0 : index
    %10 = vector.load %arg5[%c0_13, %c0_14, %c0_15, %c0_16] : memref<3x3x128x128xbf16, #tpu.memory_space<vmem>>, vector<1x1x128x128xbf16>
    %11 = vector.shape_cast %10 : vector<1x1x128x128xbf16> to vector<128x128xbf16>
    %cst = arith.constant dense<0.000000e+00> : vector<16x128xf32>
    %12 = tpu.matmul %9, %11, %cst {dimension_numbers = #tpu.dot_dimension_numbers<[1], [0], [0], [1], [0, 0, 1, 1], [], []>} : vector<16x128xbf16>, vector<128x128xbf16>, vector<16x128xf32> -> vector<16x128xf32>
    %13 = arith.addf %2, %12 : vector<16x128xf32>
    %14 = vector.extract_strided_slice %4 {offsets = [1, 0], sizes = [16, 128], strides = [1, 1]} : vector<18x128xbf16> to vector<16x128xbf16>
    %c0_17 = arith.constant 0 : index
    %c1 = arith.constant 1 : index
    %c0_18 = arith.constant 0 : index
    %c0_19 = arith.constant 0 : index
    %15 = vector.load %arg5[%c0_17, %c1, %c0_18, %c0_19] : memref<3x3x128x128xbf16, #tpu.memory_space<vmem>>, vector<1x1x128x128xbf16>
    %16 = vector.shape_cast %15 : vector<1x1x128x128xbf16> to vector<128x128xbf16>
    %cst_20 = arith.constant dense<0.000000e+00> : vector<16x128xf32>
    %17 = tpu.matmul %14, %16, %cst_20 {dimension_numbers = #tpu.dot_dimension_numbers<[1], [0], [0], [1], [0, 0, 1, 1], [], []>} : vector<16x128xbf16>, vector<128x128xbf16>, vector<16x128xf32> -> vector<16x128xf32>
    %18 = arith.addf %13, %17 : vector<16x128xf32>
    %19 = vector.extract_strided_slice %4 {offsets = [2, 0], sizes = [16, 128], strides = [1, 1]} : vector<18x128xbf16> to vector<16x128xbf16>
    %c0_21 = arith.constant 0 : index
    %c2 = arith.constant 2 : index
    %c0_22 = arith.constant 0 : index
    %c0_23 = arith.constant 0 : index
    %20 = vector.load %arg5[%c0_21, %c2, %c0_22, %c0_23] : memref<3x3x128x128xbf16, #tpu.memory_space<vmem>>, vector<1x1x128x128xbf16>
    %21 = vector.shape_cast %20 : vector<1x1x128x128xbf16> to vector<128x128xbf16>
    %cst_24 = arith.constant dense<0.000000e+00> : vector<16x128xf32>
    %22 = tpu.matmul %19, %21, %cst_24 {dimension_numbers = #tpu.dot_dimension_numbers<[1], [0], [0], [1], [0, 0, 1, 1], [], []>} : vector<16x128xbf16>, vector<128x128xbf16>, vector<16x128xf32> -> vector<16x128xf32>
    %23 = arith.addf %18, %22 : vector<16x128xf32>
    %24 = vector.extract_strided_slice %6 {offsets = [0, 0], sizes = [16, 128], strides = [1, 1]} : vector<18x128xbf16> to vector<16x128xbf16>
    %c1_25 = arith.constant 1 : index
    %c0_26 = arith.constant 0 : index
    %c0_27 = arith.constant 0 : index
    %c0_28 = arith.constant 0 : index
    %25 = vector.load %arg5[%c1_25, %c0_26, %c0_27, %c0_28] : memref<3x3x128x128xbf16, #tpu.memory_space<vmem>>, vector<1x1x128x128xbf16>
    %26 = vector.shape_cast %25 : vector<1x1x128x128xbf16> to vector<128x128xbf16>
    %cst_29 = arith.constant dense<0.000000e+00> : vector<16x128xf32>
    %27 = tpu.matmul %24, %26, %cst_29 {dimension_numbers = #tpu.dot_dimension_numbers<[1], [0], [0], [1], [0, 0, 1, 1], [], []>} : vector<16x128xbf16>, vector<128x128xbf16>, vector<16x128xf32> -> vector<16x128xf32>
    %28 = arith.addf %23, %27 : vector<16x128xf32>
    %29 = vector.extract_strided_slice %6 {offsets = [1, 0], sizes = [16, 128], strides = [1, 1]} : vector<18x128xbf16> to vector<16x128xbf16>
    %c1_30 = arith.constant 1 : index
    %c1_31 = arith.constant 1 : index
    %c0_32 = arith.constant 0 : index
    %c0_33 = arith.constant 0 : index
    %30 = vector.load %arg5[%c1_30, %c1_31, %c0_32, %c0_33] : memref<3x3x128x128xbf16, #tpu.memory_space<vmem>>, vector<1x1x128x128xbf16>
    %31 = vector.shape_cast %30 : vector<1x1x128x128xbf16> to vector<128x128xbf16>
    %cst_34 = arith.constant dense<0.000000e+00> : vector<16x128xf32>
    %32 = tpu.matmul %29, %31, %cst_34 {dimension_numbers = #tpu.dot_dimension_numbers<[1], [0], [0], [1], [0, 0, 1, 1], [], []>} : vector<16x128xbf16>, vector<128x128xbf16>, vector<16x128xf32> -> vector<16x128xf32>
    %33 = arith.addf %28, %32 : vector<16x128xf32>
    %34 = vector.extract_strided_slice %6 {offsets = [2, 0], sizes = [16, 128], strides = [1, 1]} : vector<18x128xbf16> to vector<16x128xbf16>
    %c1_35 = arith.constant 1 : index
    %c2_36 = arith.constant 2 : index
    %c0_37 = arith.constant 0 : index
    %c0_38 = arith.constant 0 : index
    %35 = vector.load %arg5[%c1_35, %c2_36, %c0_37, %c0_38] : memref<3x3x128x128xbf16, #tpu.memory_space<vmem>>, vector<1x1x128x128xbf16>
    %36 = vector.shape_cast %35 : vector<1x1x128x128xbf16> to vector<128x128xbf16>
    %cst_39 = arith.constant dense<0.000000e+00> : vector<16x128xf32>
    %37 = tpu.matmul %34, %36, %cst_39 {dimension_numbers = #tpu.dot_dimension_numbers<[1], [0], [0], [1], [0, 0, 1, 1], [], []>} : vector<16x128xbf16>, vector<128x128xbf16>, vector<16x128xf32> -> vector<16x128xf32>
    %38 = arith.addf %33, %37 : vector<16x128xf32>
    %39 = vector.extract_strided_slice %8 {offsets = [0, 0], sizes = [16, 128], strides = [1, 1]} : vector<18x128xbf16> to vector<16x128xbf16>
    %c2_40 = arith.constant 2 : index
    %c0_41 = arith.constant 0 : index
    %c0_42 = arith.constant 0 : index
    %c0_43 = arith.constant 0 : index
    %40 = vector.load %arg5[%c2_40, %c0_41, %c0_42, %c0_43] : memref<3x3x128x128xbf16, #tpu.memory_space<vmem>>, vector<1x1x128x128xbf16>
    %41 = vector.shape_cast %40 : vector<1x1x128x128xbf16> to vector<128x128xbf16>
    %cst_44 = arith.constant dense<0.000000e+00> : vector<16x128xf32>
    %42 = tpu.matmul %39, %41, %cst_44 {dimension_numbers = #tpu.dot_dimension_numbers<[1], [0], [0], [1], [0, 0, 1, 1], [], []>} : vector<16x128xbf16>, vector<128x128xbf16>, vector<16x128xf32> -> vector<16x128xf32>
    %43 = arith.addf %38, %42 : vector<16x128xf32>
    %44 = vector.extract_strided_slice %8 {offsets = [1, 0], sizes = [16, 128], strides = [1, 1]} : vector<18x128xbf16> to vector<16x128xbf16>
    %c2_45 = arith.constant 2 : index
    %c1_46 = arith.constant 1 : index
    %c0_47 = arith.constant 0 : index
    %c0_48 = arith.constant 0 : index
    %45 = vector.load %arg5[%c2_45, %c1_46, %c0_47, %c0_48] : memref<3x3x128x128xbf16, #tpu.memory_space<vmem>>, vector<1x1x128x128xbf16>
    %46 = vector.shape_cast %45 : vector<1x1x128x128xbf16> to vector<128x128xbf16>
    %cst_49 = arith.constant dense<0.000000e+00> : vector<16x128xf32>
    %47 = tpu.matmul %44, %46, %cst_49 {dimension_numbers = #tpu.dot_dimension_numbers<[1], [0], [0], [1], [0, 0, 1, 1], [], []>} : vector<16x128xbf16>, vector<128x128xbf16>, vector<16x128xf32> -> vector<16x128xf32>
    %48 = arith.addf %43, %47 : vector<16x128xf32>
    %49 = vector.extract_strided_slice %8 {offsets = [2, 0], sizes = [16, 128], strides = [1, 1]} : vector<18x128xbf16> to vector<16x128xbf16>
    %c2_50 = arith.constant 2 : index
    %c2_51 = arith.constant 2 : index
    %c0_52 = arith.constant 0 : index
    %c0_53 = arith.constant 0 : index
    %50 = vector.load %arg5[%c2_50, %c2_51, %c0_52, %c0_53] : memref<3x3x128x128xbf16, #tpu.memory_space<vmem>>, vector<1x1x128x128xbf16>
    %51 = vector.shape_cast %50 : vector<1x1x128x128xbf16> to vector<128x128xbf16>
    %cst_54 = arith.constant dense<0.000000e+00> : vector<16x128xf32>
    %52 = tpu.matmul %49, %51, %cst_54 {dimension_numbers = #tpu.dot_dimension_numbers<[1], [0], [0], [1], [0, 0, 1, 1], [], []>} : vector<16x128xbf16>, vector<128x128xbf16>, vector<16x128xf32> -> vector<16x128xf32>
    %53 = arith.addf %48, %52 : vector<16x128xf32>
    %c0_55 = arith.constant 0 : index
    %c0_56 = arith.constant 0 : index
    %c0_57 = arith.constant 0 : index
    %c0_58 = arith.constant 0 : index
    %54 = vector.load %arg7[%c0_55, %c0_56, %c0_57, %c0_58] : memref<1x1x16x128xf32, #tpu.memory_space<vmem>>, vector<1x1x16x128xf32>
    %55 = vector.shape_cast %54 : vector<1x1x16x128xf32> to vector<16x128xf32>
    %56 = vector.shape_cast %53 : vector<16x128xf32> to vector<1x1x16x128xf32>
    tpu.vector_store %arg7[%c0_55, %c0_56, %c0_57, %c0_58], %56 {strides = array<i32>} : memref<1x1x16x128xf32, #tpu.memory_space<vmem>>, vector<1x1x16x128xf32>,
    %cst_59 = arith.constant dense<0.000000e+00> : vector<128xf32>
    %57 = vector.multi_reduction <add>, %53, %cst_59 [0] : vector<16x128xf32> to vector<128xf32>
    %58 = vector.shape_cast %57 : vector<128xf32> to vector<1x128xf32>
    %c0_60 = arith.constant 0 : index
    %c0_61 = arith.constant 0 : index
    %c0_62 = arith.constant 0 : index
    %c0_63 = arith.constant 0 : index
    %59 = vector.load %arg8[%c0_60, %c0_61, %c0_62, %c0_63] : memref<1x1x1x128xf32, #tpu.memory_space<vmem>>, vector<1x1x1x128xf32>
    %60 = vector.shape_cast %59 : vector<1x1x1x128xf32> to vector<1x128xf32>
    %61 = vector.shape_cast %58 : vector<1x128xf32> to vector<1x1x1x128xf32>
    tpu.vector_store %arg8[%c0_60, %c0_61, %c0_62, %c0_63], %61 {strides = array<i32>} : memref<1x1x1x128xf32, #tpu.memory_space<vmem>>, vector<1x1x1x128xf32>,
    %62 = arith.mulf %53, %53 : vector<16x128xf32>
    %cst_64 = arith.constant dense<0.000000e+00> : vector<128xf32>
    %63 = vector.multi_reduction <add>, %62, %cst_64 [0] : vector<16x128xf32> to vector<128xf32>
    %64 = vector.shape_cast %63 : vector<128xf32> to vector<1x128xf32>
    %c0_65 = arith.constant 0 : index
    %c0_66 = arith.constant 0 : index
    %c0_67 = arith.constant 0 : index
    %c0_68 = arith.constant 0 : index
    %65 = vector.load %arg9[%c0_65, %c0_66, %c0_67, %c0_68] : memref<1x1x1x128xf32, #tpu.memory_space<vmem>>, vector<1x1x1x128xf32>
    %66 = vector.shape_cast %65 : vector<1x1x1x128xf32> to vector<1x128xf32>
    %67 = vector.shape_cast %64 : vector<1x128xf32> to vector<1x1x1x128xf32>
    tpu.vector_store %arg9[%c0_65, %c0_66, %c0_67, %c0_68], %67 {strides = array<i32>} : memref<1x1x1x128xf32, #tpu.memory_space<vmem>>, vector<1x1x1x128xf32>,
    return
  }
  func.func @transform_0(%arg0: i32, %arg1: i32) -> (i32, i32, i32, i32) {
    %c0_i32 = arith.constant 0 : i32
    %0 = arith.addi %arg1, %c0_i32 : i32
    %c0_i32_0 = arith.constant 0 : i32
    %c0_i32_1 = arith.constant 0 : i32
    %c0_i32_2 = arith.constant 0 : i32
    return %arg0, %0, %c0_i32_0, %c0_i32_1 : i32, i32, i32, i32
  }
  func.func @transform_1(%arg0: i32, %arg1: i32) -> (i32, i32, i32, i32) {
    %c1_i32 = arith.constant 1 : i32
    %0 = arith.addi %arg1, %c1_i32 : i32
    %c0_i32 = arith.constant 0 : i32
    %c0_i32_0 = arith.constant 0 : i32
    %c0_i32_1 = arith.constant 0 : i32
    return %arg0, %0, %c0_i32, %c0_i32_0 : i32, i32, i32, i32
  }
  func.func @transform_2(%arg0: i32, %arg1: i32) -> (i32, i32, i32, i32) {
    %c2_i32 = arith.constant 2 : i32
    %0 = arith.addi %arg1, %c2_i32 : i32
    %c0_i32 = arith.constant 0 : i32
    %c0_i32_0 = arith.constant 0 : i32
    %c0_i32_1 = arith.constant 0 : i32
    return %arg0, %0, %c0_i32, %c0_i32_0 : i32, i32, i32, i32
  }
  func.func @transform_3(%arg0: i32, %arg1: i32) -> (i32, i32, i32, i32) {
    %c0_i32 = arith.constant 0 : i32
    %c0_i32_0 = arith.constant 0 : i32
    %c0_i32_1 = arith.constant 0 : i32
    %c0_i32_2 = arith.constant 0 : i32
    %c0_i32_3 = arith.constant 0 : i32
    return %c0_i32, %c0_i32_0, %c0_i32_1, %c0_i32_2 : i32, i32, i32, i32
  }
  func.func @transform_4(%arg0: i32, %arg1: i32) -> (i32, i32) {
    %c0_i32 = arith.constant 0 : i32
    %c0_i32_0 = arith.constant 0 : i32
    %c0_i32_1 = arith.constant 0 : i32
    return %c0_i32, %c0_i32_0 : i32, i32
  }
  func.func @transform_5(%arg0: i32, %arg1: i32) -> (i32, i32, i32, i32) {
    %c0_i32 = arith.constant 0 : i32
    %c0_i32_0 = arith.constant 0 : i32
    %c0_i32_1 = arith.constant 0 : i32
    return %arg0, %arg1, %c0_i32, %c0_i32_0 : i32, i32, i32, i32
  }
  func.func @transform_6(%arg0: i32, %arg1: i32) -> (i32, i32, i32, i32) {
    %c0_i32 = arith.constant 0 : i32
    %c0_i32_0 = arith.constant 0 : i32
    %c0_i32_1 = arith.constant 0 : i32
    return %arg0, %arg1, %c0_i32, %c0_i32_0 : i32, i32, i32, i32
  }
  func.func @transform_7(%arg0: i32, %arg1: i32) -> (i32, i32, i32, i32) {
    %c0_i32 = arith.constant 0 : i32
    %c0_i32_0 = arith.constant 0 : i32
    %c0_i32_1 = arith.constant 0 : i32
    return %arg0, %arg1, %c0_i32, %c0_i32_0 : i32, i32, i32, i32
  }
}

module attributes {stable_mosaic.version = 11 : i64} {
  func.func @_bn_relu_pad_kernel(%arg0: i32, %arg1: i32, %arg2: memref<1x1x16x128xf32, #tpu.memory_space<vmem>>, %arg3: memref<1x128xf32, #tpu.memory_space<vmem>>, %arg4: memref<1x128xf32, #tpu.memory_space<vmem>>, %arg5: memref<1x1x18x128xbf16, #tpu.memory_space<vmem>>) attributes {dimension_semantics = [#tpu.dimension_semantics<parallel>, #tpu.dimension_semantics<parallel>], iteration_bounds = array<i64: 2, 18>, scalar_prefetch = 0 : i64, scratch_operands = 0 : i64, tpu.core_type = #tpu.core_type<tc>, window_params = [{transform_indices = @transform_0, window_bounds = array<i64: 1, 1, 16, 128>}, {pipeline_mode = #tpu.pipeline_mode<synchronous>, transform_indices = @transform_1, window_bounds = array<i64: 1, 128>}, {pipeline_mode = #tpu.pipeline_mode<synchronous>, transform_indices = @transform_2, window_bounds = array<i64: 1, 128>}, {transform_indices = @transform_3, window_bounds = array<i64: 1, 1, 18, 128>}]} {
    %cst = arith.constant 0.000000e+00 : bf16
    %0 = vector.broadcast %cst : bf16 to vector<1x1x18x128xbf16>
    %c0 = arith.constant 0 : index
    %c0_0 = arith.constant 0 : index
    %c0_1 = arith.constant 0 : index
    %c0_2 = arith.constant 0 : index
    %1 = vector.load %arg5[%c0, %c0_0, %c0_1, %c0_2] : memref<1x1x18x128xbf16, #tpu.memory_space<vmem>>, vector<1x1x18x128xbf16>
    tpu.vector_store %arg5[%c0, %c0_0, %c0_1, %c0_2], %0 {strides = array<i32>} : memref<1x1x18x128xbf16, #tpu.memory_space<vmem>>, vector<1x1x18x128xbf16>,
    %c0_i32 = arith.constant 0 : i32
    %2 = arith.cmpi sgt, %arg1, %c0_i32 : i32
    %c17_i32 = arith.constant 17 : i32
    %3 = arith.cmpi slt, %arg1, %c17_i32 : i32
    %4 = arith.andi %2, %3 : i1
    %5 = arith.extui %4 : i1 to i32
    %c0_i32_3 = arith.constant 0 : i32
    %6 = arith.cmpi ne, %5, %c0_i32_3 : i32
    scf.if %6 {
      %c0_4 = arith.constant 0 : index
      %c0_5 = arith.constant 0 : index
      %c0_6 = arith.constant 0 : index
      %c0_7 = arith.constant 0 : index
      %7 = vector.load %arg2[%c0_4, %c0_5, %c0_6, %c0_7] : memref<1x1x16x128xf32, #tpu.memory_space<vmem>>, vector<1x1x16x128xf32>
      %8 = vector.shape_cast %7 : vector<1x1x16x128xf32> to vector<16x128xf32>
      %c0_8 = arith.constant 0 : index
      %c0_9 = arith.constant 0 : index
      %9 = vector.load %arg3[%c0_8, %c0_9] : memref<1x128xf32, #tpu.memory_space<vmem>>, vector<1x128xf32>
      %10 = vector.broadcast %9 : vector<1x128xf32> to vector<16x128xf32>
      %11 = arith.mulf %8, %10 : vector<16x128xf32>
      %c0_10 = arith.constant 0 : index
      %c0_11 = arith.constant 0 : index
      %12 = vector.load %arg4[%c0_10, %c0_11] : memref<1x128xf32, #tpu.memory_space<vmem>>, vector<1x128xf32>
      %13 = vector.broadcast %12 : vector<1x128xf32> to vector<16x128xf32>
      %14 = arith.addf %11, %13 : vector<16x128xf32>
      %cst_12 = arith.constant 0.000000e+00 : f32
      %15 = vector.broadcast %cst_12 : f32 to vector<16x128xf32>
      %16 = arith.maximumf %14, %15 : vector<16x128xf32>
      %17 = arith.truncf %16 : vector<16x128xf32> to vector<16x128xbf16>
      %c0_13 = arith.constant 0 : index
      %c0_14 = arith.constant 0 : index
      %c1 = arith.constant 1 : index
      %c0_15 = arith.constant 0 : index
      %18 = vector.load %arg5[%c0_13, %c0_14, %c1, %c0_15] : memref<1x1x18x128xbf16, #tpu.memory_space<vmem>>, vector<1x1x16x128xbf16>
      %19 = vector.shape_cast %18 : vector<1x1x16x128xbf16> to vector<16x128xbf16>
      %20 = vector.shape_cast %17 : vector<16x128xbf16> to vector<1x1x16x128xbf16>
      tpu.vector_store %arg5[%c0_13, %c0_14, %c1, %c0_15], %20 {strides = array<i32>} : memref<1x1x18x128xbf16, #tpu.memory_space<vmem>>, vector<1x1x16x128xbf16>,
    } else {
    }
    return
  }
  func.func @transform_0(%arg0: i32, %arg1: i32) -> (i32, i32, i32, i32) {
    %c1_i32 = arith.constant 1 : i32
    %0 = arith.subi %arg1, %c1_i32 : i32
    %c0_i32 = arith.constant 0 : i32
    %c15_i32 = arith.constant 15 : i32
    %1 = arith.maxsi %c0_i32, %0 : i32
    %2 = arith.minsi %c15_i32, %1 : i32
    %c0_i32_0 = arith.constant 0 : i32
    %c0_i32_1 = arith.constant 0 : i32
    %c0_i32_2 = arith.constant 0 : i32
    return %arg0, %2, %c0_i32_0, %c0_i32_1 : i32, i32, i32, i32
  }
  func.func @transform_1(%arg0: i32, %arg1: i32) -> (i32, i32) {
    %c0_i32 = arith.constant 0 : i32
    %c0_i32_0 = arith.constant 0 : i32
    %c0_i32_1 = arith.constant 0 : i32
    return %c0_i32, %c0_i32_0 : i32, i32
  }
  func.func @transform_2(%arg0: i32, %arg1: i32) -> (i32, i32) {
    %c0_i32 = arith.constant 0 : i32
    %c0_i32_0 = arith.constant 0 : i32
    %c0_i32_1 = arith.constant 0 : i32
    return %c0_i32, %c0_i32_0 : i32, i32
  }
  func.func @transform_3(%arg0: i32, %arg1: i32) -> (i32, i32, i32, i32) {
    %c0_i32 = arith.constant 0 : i32
    %c0_i32_0 = arith.constant 0 : i32
    %c0_i32_1 = arith.constant 0 : i32
    return %arg0, %arg1, %c0_i32, %c0_i32_0 : i32, i32, i32, i32
  }
}

module attributes {stable_mosaic.version = 11 : i64} {
  func.func @_bn_relu_pad_kernel(%arg0: i32, %arg1: i32, %arg2: memref<1x1x16x128xf32, #tpu.memory_space<vmem>>, %arg3: memref<1x128xf32, #tpu.memory_space<vmem>>, %arg4: memref<1x128xf32, #tpu.memory_space<vmem>>, %arg5: memref<1x1x18x128xf32, #tpu.memory_space<vmem>>) attributes {dimension_semantics = [#tpu.dimension_semantics<parallel>, #tpu.dimension_semantics<parallel>], iteration_bounds = array<i64: 2, 18>, scalar_prefetch = 0 : i64, scratch_operands = 0 : i64, tpu.core_type = #tpu.core_type<tc>, window_params = [{transform_indices = @transform_0, window_bounds = array<i64: 1, 1, 16, 128>}, {pipeline_mode = #tpu.pipeline_mode<synchronous>, transform_indices = @transform_1, window_bounds = array<i64: 1, 128>}, {pipeline_mode = #tpu.pipeline_mode<synchronous>, transform_indices = @transform_2, window_bounds = array<i64: 1, 128>}, {transform_indices = @transform_3, window_bounds = array<i64: 1, 1, 18, 128>}]} {
    %cst = arith.constant 0.000000e+00 : f32
    %0 = vector.broadcast %cst : f32 to vector<1x1x18x128xf32>
    %c0 = arith.constant 0 : index
    %c0_0 = arith.constant 0 : index
    %c0_1 = arith.constant 0 : index
    %c0_2 = arith.constant 0 : index
    %1 = vector.load %arg5[%c0, %c0_0, %c0_1, %c0_2] : memref<1x1x18x128xf32, #tpu.memory_space<vmem>>, vector<1x1x18x128xf32>
    tpu.vector_store %arg5[%c0, %c0_0, %c0_1, %c0_2], %0 {strides = array<i32>} : memref<1x1x18x128xf32, #tpu.memory_space<vmem>>, vector<1x1x18x128xf32>,
    %c0_i32 = arith.constant 0 : i32
    %2 = arith.cmpi sgt, %arg1, %c0_i32 : i32
    %c17_i32 = arith.constant 17 : i32
    %3 = arith.cmpi slt, %arg1, %c17_i32 : i32
    %4 = arith.andi %2, %3 : i1
    %5 = arith.extui %4 : i1 to i32
    %c0_i32_3 = arith.constant 0 : i32
    %6 = arith.cmpi ne, %5, %c0_i32_3 : i32
    scf.if %6 {
      %c0_4 = arith.constant 0 : index
      %c0_5 = arith.constant 0 : index
      %c0_6 = arith.constant 0 : index
      %c0_7 = arith.constant 0 : index
      %7 = vector.load %arg2[%c0_4, %c0_5, %c0_6, %c0_7] : memref<1x1x16x128xf32, #tpu.memory_space<vmem>>, vector<1x1x16x128xf32>
      %8 = vector.shape_cast %7 : vector<1x1x16x128xf32> to vector<16x128xf32>
      %c0_8 = arith.constant 0 : index
      %c0_9 = arith.constant 0 : index
      %9 = vector.load %arg3[%c0_8, %c0_9] : memref<1x128xf32, #tpu.memory_space<vmem>>, vector<1x128xf32>
      %10 = vector.broadcast %9 : vector<1x128xf32> to vector<16x128xf32>
      %11 = arith.mulf %8, %10 : vector<16x128xf32>
      %c0_10 = arith.constant 0 : index
      %c0_11 = arith.constant 0 : index
      %12 = vector.load %arg4[%c0_10, %c0_11] : memref<1x128xf32, #tpu.memory_space<vmem>>, vector<1x128xf32>
      %13 = vector.broadcast %12 : vector<1x128xf32> to vector<16x128xf32>
      %14 = arith.addf %11, %13 : vector<16x128xf32>
      %cst_12 = arith.constant 0.000000e+00 : f32
      %15 = vector.broadcast %cst_12 : f32 to vector<16x128xf32>
      %16 = arith.maximumf %14, %15 : vector<16x128xf32>
      %c0_13 = arith.constant 0 : index
      %c0_14 = arith.constant 0 : index
      %c1 = arith.constant 1 : index
      %c0_15 = arith.constant 0 : index
      %17 = vector.load %arg5[%c0_13, %c0_14, %c1, %c0_15] : memref<1x1x18x128xf32, #tpu.memory_space<vmem>>, vector<1x1x16x128xf32>
      %18 = vector.shape_cast %17 : vector<1x1x16x128xf32> to vector<16x128xf32>
      %19 = vector.shape_cast %16 : vector<16x128xf32> to vector<1x1x16x128xf32>
      tpu.vector_store %arg5[%c0_13, %c0_14, %c1, %c0_15], %19 {strides = array<i32>} : memref<1x1x18x128xf32, #tpu.memory_space<vmem>>, vector<1x1x16x128xf32>,
    } else {
    }
    return
  }
  func.func @transform_0(%arg0: i32, %arg1: i32) -> (i32, i32, i32, i32) {
    %c1_i32 = arith.constant 1 : i32
    %0 = arith.subi %arg1, %c1_i32 : i32
    %c0_i32 = arith.constant 0 : i32
    %c15_i32 = arith.constant 15 : i32
    %1 = arith.maxsi %c0_i32, %0 : i32
    %2 = arith.minsi %c15_i32, %1 : i32
    %c0_i32_0 = arith.constant 0 : i32
    %c0_i32_1 = arith.constant 0 : i32
    %c0_i32_2 = arith.constant 0 : i32
    return %arg0, %2, %c0_i32_0, %c0_i32_1 : i32, i32, i32, i32
  }
  func.func @transform_1(%arg0: i32, %arg1: i32) -> (i32, i32) {
    %c0_i32 = arith.constant 0 : i32
    %c0_i32_0 = arith.constant 0 : i32
    %c0_i32_1 = arith.constant 0 : i32
    return %c0_i32, %c0_i32_0 : i32, i32
  }
  func.func @transform_2(%arg0: i32, %arg1: i32) -> (i32, i32) {
    %c0_i32 = arith.constant 0 : i32
    %c0_i32_0 = arith.constant 0 : i32
    %c0_i32_1 = arith.constant 0 : i32
    return %c0_i32, %c0_i32_0 : i32, i32
  }
  func.func @transform_3(%arg0: i32, %arg1: i32) -> (i32, i32, i32, i32) {
    %c0_i32 = arith.constant 0 : i32
    %c0_i32_0 = arith.constant 0 : i32
    %c0_i32_1 = arith.constant 0 : i32
    return %arg0, %arg1, %c0_i32, %c0_i32_0 : i32, i32, i32, i32
  }
}

</mosaic_0001>

<bundles_post_ra>
// kernel: tile.8
= control target key start
LH: loop header
LB: loop body
LE: loop exit
PB: predicated region body
PF: predicated region fallthrough
CT: control target
= control target key end

     0   :  { %s22_s0 = inlined_call_operand.vmem [shape: f32[4], index: 0, kind: input, shape index: {}]   ;;  %s23_s1 = inlined_call_operand.vmem [shape: f32[4,4], index: 1, kind: output, shape index: {}]  }
   0x1   :  { %v4_v0 = vld [vmem:[%s22_s0] ss:$0 sm:$0xff] }
   0x2   :  { %5 = vst [vmem:[%s23_s1] sm:$0xf] %v4_v0 }

// kernel: tile.9
= control target key start
LH: loop header
LB: loop body
LE: loop exit
PB: predicated region body
PF: predicated region fallthrough
CT: control target
= control target key end

     0   :  { %vm7_vm0 = vcmask 31744   ;;  %s37_s8 = smov 4   ;;  %s38_s9 = smov 8   ;;  %vm13_vm1 = vcmask 130144   ;;  %vm19_vm2 = vcmask 97344   ;;  %vm25_vm3 = vcmask 64544   ;;  %s55_s0 = inlined_call_operand.vmem [shape: f32[4,4], index: 0, kind: input, shape index: {}]   ;;  %s56_s1 = inlined_call_operand.vmem [shape: f32[16], index: 1, kind: output, shape index: {}]  }
   0x1   :  { %v4_v0 = vld [vmem:[%s55_s0] sm:$0xf]  ;;  %s36_s0 = smov 12  }
   0x2   :  { %5 = vst [vmem:[#allocation1] sm:$0xf] %v4_v0 }
   0x9   :  { %v10_v1 = vld [vmem:[#allocation1 + $0x3] sm:$0x1]   ;;  %v22_v2 = vld [vmem:[#allocation1 + $0x1] sm:$0x1]   ;;  %v6_v3 = vld [vmem:[#allocation1] sm:$0x1]  }
   0xa   :  { %11 = vrot.lane.b32.xlu0 %v10_v1, %s36_s0  ;;  %23 = vrot.lane.b32.xlu1 %v22_v2, %s37_s8  ;;  %v16_v4 = vld [vmem:[#allocation1 + $0x2] sm:$0x1]   ;;  %8 = vst.msk [vmem:[#allocation0] sm:$0x1] %vm7_vm0, %v6_v3  }
   0xe   :  { %17 = vrot.lane.b32.xlu0 %v16_v4, %s38_s9 }
  0x7c   :  { %v12_v5 = vpop.permute.xlu0 %11   ;;  %v24_v6 = vpop.permute.xlu1 %23  }
  0x7d   :  { %14 = vst.msk [vmem:[#allocation0] sm:$0x1] %vm13_vm1, %v12_v5  }
  0x80   :  { %v18_v7 = vpop.permute.xlu0 %17  }
  0x81   :  { %20 = vst.msk [vmem:[#allocation0] sm:$0x1] %vm19_vm2, %v18_v7  }
  0x82   :  { %26 = vst.msk [vmem:[#allocation0] sm:$0x1] %vm25_vm3, %v24_v6  }
  0x89   :  { %v30_v8 = vld [vmem:[#allocation0] sm:$0x1] }
  0x8a   :  { %32 = vst [vmem:[%s56_s1] sm:$0x1] %v30_v8 }

// kernel: decoder_forward.5
= control target key start
LH: loop header
LB: loop body
LE: loop exit
PB: predicated region body
PF: predicated region fallthrough
CT: control target
= control target key end

     0   :  { %s773_s1 = inlined_call_operand.vmem [shape: bf16[128,128], index: 1, kind: input, shape index: {}]   ;;  %s774_s0 = inlined_call_operand.vmem [shape: bf16[256,128], index: 0, kind: input, shape index: {}]   ;;  %s775_s2 = inlined_call_operand.vmem [shape: f32[1,128], index: 2, kind: input, shape index: {}]   ;;  %s776_s3 = inlined_call_operand.vmem [shape: f32[256,128], index: 3, kind: output, shape index: {}]  }
   0x1   :  { %v524_v0 = vld [vmem:[%s773_s1] sm:$0xff]   ;;  %v525_v1 = vld [vmem:[%s773_s1 + $0x8] sm:$0xff]   ;;  %v526_v2 = vld [vmem:[%s773_s1 + $0x10] sm:$0xff]  }
   0x2   :  { %460 = vmatprep.subr.bf16.mxu0 %v524_v0  ;;  %508 = vmatprep.subr.bf16.mxu1 %v524_v0  ;;  %v527_v3 = vld [vmem:[%s773_s1 + $0x18] sm:$0xff]   ;;  %v532_v4 = vld [vmem:[%s774_s0] sm:$0xff]   ;;  %v529_v7 = vld [vmem:[%s773_s1 + $0x28] sm:$0xff]  }
   0x3   :  { %461 = vmatpush3.bf16.msra.mxu0 %v524_v0  ;;  %516 = vmatpush3.bf16.msra.mxu1 %v524_v0  ;;  %v533_v5 = vld [vmem:[%s774_s0 + $0x40] sm:$0xff]   ;;  %v530_v8 = vld [vmem:[%s773_s1 + $0x30] sm:$0xff]   ;;  %v531_v9 = vld [vmem:[%s773_s1 + $0x38] sm:$0xff]  }
   0x4   :  { %462 = vmatprep.subr.bf16.mxu0 %v525_v1  ;;  %509 = vmatprep.subr.bf16.mxu1 %v525_v1  ;;  %v528_v6 = vld [vmem:[%s773_s1 + $0x20] sm:$0xff]   ;;  %v534_v10 = vld [vmem:[%s774_s0 + $0x8] sm:$0xff]   ;;  %v536_v12 = vld [vmem:[%s774_s0 + $0x10] sm:$0xff]  }
   0x5   :  { %476 = vmatprep.mubr.bf16.mxu0 %v532_v4  ;;  %492 = vmatprep.mubr.bf16.mxu1 %v533_v5  ;;  %v535_v11 = vld [vmem:[%s774_s0 + $0x48] sm:$0xff]   ;;  %v537_v13 = vld [vmem:[%s774_s0 + $0x50] sm:$0xff]   ;;  %v538_v14 = vld [vmem:[%s774_s0 + $0x18] sm:$0xff]  }
   0x6   :  { %v539_v15 = vld [vmem:[%s774_s0 + $0x58] sm:$0xff]   ;;  %v540_v16 = vld [vmem:[%s774_s0 + $0x20] sm:$0xff]   ;;  %v542_v18 = vld [vmem:[%s774_s0 + $0x28] sm:$0xff]  }
   0x7   :  { %463 = vmatpush3.bf16.msra.mxu0 %v525_v1  ;;  %517 = vmatpush3.bf16.msra.mxu1 %v525_v1  ;;  %v541_v17 = vld [vmem:[%s774_s0 + $0x60] sm:$0xff]   ;;  %v543_v19 = vld [vmem:[%s774_s0 + $0x68] sm:$0xff]   ;;  %v544_v20 = vld [vmem:[%s774_s0 + $0x30] sm:$0xff]  }
   0x8   :  { %464 = vmatprep.subr.bf16.mxu0 %v526_v2  ;;  %510 = vmatprep.subr.bf16.mxu1 %v526_v2  ;;  %v545_v21 = vld [vmem:[%s774_s0 + $0x70] sm:$0xff]   ;;  %v546_v22 = vld [vmem:[%s774_s0 + $0x38] sm:$0xff]   ;;  %v643_v24 = vld [vmem:[%s775_s2] ss:$0 sm:$0xff] }
   0x9   :  { %v547_v23 = vld [vmem:[%s774_s0 + $0x78] sm:$0xff]  }
   0xb   :  { %465 = vmatpush3.bf16.msra.mxu0 %v526_v2  ;;  %518 = vmatpush3.bf16.msra.mxu1 %v526_v2 }
   0xc   :  { %466 = vmatprep.subr.bf16.mxu0 %v527_v3  ;;  %511 = vmatprep.subr.bf16.mxu1 %v527_v3 }
   0xf   :  { %467 = vmatpush3.bf16.msra.mxu0 %v527_v3  ;;  %519 = vmatpush3.bf16.msra.mxu1 %v527_v3 }
  0x10   :  { %468 = vmatprep.subr.bf16.mxu0 %v528_v6  ;;  %512 = vmatprep.subr.bf16.mxu1 %v528_v6 }
  0x13   :  { %469 = vmatpush3.bf16.msra.mxu0 %v528_v6  ;;  %520 = vmatpush3.bf16.msra.mxu1 %v528_v6 }
  0x14   :  { %470 = vmatprep.subr.bf16.mxu0 %v529_v7  ;;  %513 = vmatprep.subr.bf16.mxu1 %v529_v7 }
  0x17   :  { %471 = vmatpush3.bf16.msra.mxu0 %v529_v7  ;;  %521 = vmatpush3.bf16.msra.mxu1 %v529_v7 }
  0x18   :  { %472 = vmatprep.subr.bf16.mxu0 %v530_v8  ;;  %514 = vmatprep.subr.bf16.mxu1 %v530_v8 }
  0x1b   :  { %473 = vmatpush3.bf16.msra.mxu0 %v530_v8  ;;  %522 = vmatpush3.bf16.msra.mxu1 %v530_v8 }
  0x1c   :  { %474 = vmatprep.subr.bf16.mxu0 %v531_v9  ;;  %515 = vmatprep.subr.bf16.mxu1 %v531_v9 }
  0x1f   :  { %475 = vmatpush3.bf16.msra.mxu0 %v531_v9  ;;  %523 = vmatpush3.bf16.msra.mxu1 %v531_v9 }
  0x22   :  { %477 = vmatmul.mubr.bf16.vlgmr.msra.gmra.mrb[0].mxu0 %v534_v10  ;;  %493 = vmatmul.mubr.bf16.vlgmr.msra.gmra.mrb[0].mxu1 %v535_v11 }
  0x23   :  { %480 = vmatprep.mubr.bf16.mxu0 %v536_v12  ;;  %496 = vmatprep.mubr.bf16.mxu1 %v537_v13 }
  0x2a   :  { %481 = vmatmul.mubr.bf16.gmra.mrb[4].mxu0 %v538_v14  ;;  %497 = vmatmul.mubr.bf16.gmra.mrb[4].mxu1 %v539_v15 }
  0x2b   :  { %484 = vmatprep.mubr.bf16.mxu0 %v540_v16  ;;  %500 = vmatprep.mubr.bf16.mxu1 %v541_v17 }
  0x32   :  { %485 = vmatmul.mubr.bf16.gmra.mrb[8].mxu0 %v542_v18  ;;  %501 = vmatmul.mubr.bf16.gmra.mrb[8].mxu1 %v543_v19 }
  0x33   :  { %488 = vmatprep.mubr.bf16.mxu0 %v544_v20  ;;  %504 = vmatprep.mubr.bf16.mxu1 %v545_v21 }
  0x3a   :  { %489 = vmatmul.mubr.bf16.gmra.mrb[12].mxu0 %v546_v22  ;;  %505 = vmatmul.mubr.bf16.gmra.mrb[12].mxu1 %v547_v23 }
  0xf5   :  { %v478_v25 = vpop.f32.mrb[0].mxu0  ;;  %v494_v26 = vpop.f32.mrb[0].mxu1 }
  0xf6   :  { %v257_v27 = vadd.f32 %v478_v25, %v643_v24  ;;  %v321_v28 = vadd.f32 %v494_v26, %v643_v24  ;;  %v248_v29 = vpop.f32.mrb[1].mxu0  ;;  %v312_v30 = vpop.f32.mrb[1].mxu1 }
  0xf7   :  { %v249_v31 = vadd.f32 %v643_v24, %v248_v29  ;;  %v313_v32 = vadd.f32 %v643_v24, %v312_v30  ;;  %v479_v33 = vpop.f32.mrb[2].mxu0  ;;  %v495_v34 = vpop.f32.mrb[2].mxu1 }
  0xf8   :  { %377 = vst [vmem:[%s776_s3 + $0x10] sm:$0xff] %v257_v27  ;;  %393 = vst [vmem:[%s776_s3 + $0x90] sm:$0xff] %v321_v28  ;;  %v260_v35 = vadd.f32 %v479_v33, %v643_v24  ;;  %v324_v36 = vadd.f32 %v495_v34, %v643_v24  ;;  %v251_v37 = vpop.f32.mrb[3].mxu0  ;;  %v315_v38 = vpop.f32.mrb[3].mxu1 }
  0xf9   :  { %375 = vst [vmem:[%s776_s3] sm:$0xff] %v249_v31  ;;  %391 = vst [vmem:[%s776_s3 + $0x80] sm:$0xff] %v313_v32  ;;  %v252_v39 = vadd.f32 %v643_v24, %v251_v37  ;;  %v316_v40 = vadd.f32 %v643_v24, %v315_v38 }
  0xfa   :  { %378 = vst [vmem:[%s776_s3 + $0x18] sm:$0xff] %v260_v35  ;;  %394 = vst [vmem:[%s776_s3 + $0x98] sm:$0xff] %v324_v36 }
  0xfb   :  { %376 = vst [vmem:[%s776_s3 + $0x8] sm:$0xff] %v252_v39  ;;  %392 = vst [vmem:[%s776_s3 + $0x88] sm:$0xff] %v316_v40 }
  0xfd   :  { %v482_v41 = vpop.f32.mrb[4].mxu0  ;;  %v498_v42 = vpop.f32.mrb[4].mxu1 }
  0xfe   :  { %v273_v43 = vadd.f32 %v482_v41, %v643_v24  ;;  %v337_v44 = vadd.f32 %v498_v42, %v643_v24  ;;  %v264_v45 = vpop.f32.mrb[5].mxu0  ;;  %v328_v46 = vpop.f32.mrb[5].mxu1 }
  0xff   :  { %v265_v47 = vadd.f32 %v643_v24, %v264_v45  ;;  %v329_v48 = vadd.f32 %v643_v24, %v328_v46  ;;  %v483_v49 = vpop.f32.mrb[6].mxu0  ;;  %v499_v50 = vpop.f32.mrb[6].mxu1 }
 0x100   :  { %381 = vst [vmem:[%s776_s3 + $0x30] sm:$0xff] %v273_v43  ;;  %397 = vst [vmem:[%s776_s3 + $0xb0] sm:$0xff] %v337_v44  ;;  %v276_v51 = vadd.f32 %v483_v49, %v643_v24  ;;  %v340_v52 = vadd.f32 %v499_v50, %v643_v24  ;;  %v267_v53 = vpop.f32.mrb[7].mxu0  ;;  %v331_v54 = vpop.f32.mrb[7].mxu1 }
 0x101   :  { %379 = vst [vmem:[%s776_s3 + $0x20] sm:$0xff] %v265_v47  ;;  %395 = vst [vmem:[%s776_s3 + $0xa0] sm:$0xff] %v329_v48  ;;  %v268_v55 = vadd.f32 %v643_v24, %v267_v53  ;;  %v332_v56 = vadd.f32 %v643_v24, %v331_v54 }
 0x102   :  { %382 = vst [vmem:[%s776_s3 + $0x38] sm:$0xff] %v276_v51  ;;  %398 = vst [vmem:[%s776_s3 + $0xb8] sm:$0xff] %v340_v52 }
 0x103   :  { %380 = vst [vmem:[%s776_s3 + $0x28] sm:$0xff] %v268_v55  ;;  %396 = vst [vmem:[%s776_s3 + $0xa8] sm:$0xff] %v332_v56 }
 0x105   :  { %v486_v57 = vpop.f32.mrb[8].mxu0  ;;  %v502_v58 = vpop.f32.mrb[8].mxu1 }
 0x106   :  { %v289_v59 = vadd.f32 %v486_v57, %v643_v24  ;;  %v353_v60 = vadd.f32 %v502_v58, %v643_v24  ;;  %v280_v61 = vpop.f32.mrb[9].mxu0  ;;  %v344_v62 = vpop.f32.mrb[9].mxu1 }
 0x107   :  { %v281_v63 = vadd.f32 %v643_v24, %v280_v61  ;;  %v345_v0 = vadd.f32 %v643_v24, %v344_v62  ;;  %v487_v1 = vpop.f32.mrb[10].mxu0  ;;  %v503_v2 = vpop.f32.mrb[10].mxu1 }
 0x108   :  { %385 = vst [vmem:[%s776_s3 + $0x50] sm:$0xff] %v289_v59  ;;  %401 = vst [vmem:[%s776_s3 + $0xd0] sm:$0xff] %v353_v60  ;;  %v292_v3 = vadd.f32 %v487_v1, %v643_v24  ;;  %v356_v4 = vadd.f32 %v503_v2, %v643_v24  ;;  %v283_v5 = vpop.f32.mrb[11].mxu0  ;;  %v347_v6 = vpop.f32.mrb[11].mxu1 }
 0x109   :  { %383 = vst [vmem:[%s776_s3 + $0x40] sm:$0xff] %v281_v63  ;;  %399 = vst [vmem:[%s776_s3 + $0xc0] sm:$0xff] %v345_v0  ;;  %v284_v7 = vadd.f32 %v643_v24, %v283_v5  ;;  %v348_v8 = vadd.f32 %v643_v24, %v347_v6 }
 0x10a   :  { %386 = vst [vmem:[%s776_s3 + $0x58] sm:$0xff] %v292_v3  ;;  %402 = vst [vmem:[%s776_s3 + $0xd8] sm:$0xff] %v356_v4 }
 0x10b   :  { %384 = vst [vmem:[%s776_s3 + $0x48] sm:$0xff] %v284_v7  ;;  %400 = vst [vmem:[%s776_s3 + $0xc8] sm:$0xff] %v348_v8 }
 0x10d   :  { %v490_v9 = vpop.f32.mrb[12].mxu0  ;;  %v506_v10 = vpop.f32.mrb[12].mxu1 }
 0x10e   :  { %v305_v11 = vadd.f32 %v490_v9, %v643_v24  ;;  %v369_v12 = vadd.f32 %v506_v10, %v643_v24  ;;  %v296_v13 = vpop.f32.mrb[13].mxu0  ;;  %v360_v14 = vpop.f32.mrb[13].mxu1 }
 0x10f   :  { %v297_v15 = vadd.f32 %v643_v24, %v296_v13  ;;  %v361_v16 = vadd.f32 %v643_v24, %v360_v14  ;;  %v491_v17 = vpop.f32.mrb[14].mxu0  ;;  %v507_v18 = vpop.f32.mrb[14].mxu1 }
 0x110   :  { %389 = vst [vmem:[%s776_s3 + $0x70] sm:$0xff] %v305_v11  ;;  %405 = vst [vmem:[%s776_s3 + $0xf0] sm:$0xff] %v369_v12  ;;  %v308_v19 = vadd.f32 %v491_v17, %v643_v24  ;;  %v372_v20 = vadd.f32 %v507_v18, %v643_v24  ;;  %v299_v21 = vpop.f32.mrb[15].mxu0  ;;  %v363_v22 = vpop.f32.mrb[15].mxu1 }
 0x111   :  { %387 = vst [vmem:[%s776_s3 + $0x60] sm:$0xff] %v297_v15  ;;  %403 = vst [vmem:[%s776_s3 + $0xe0] sm:$0xff] %v361_v16  ;;  %v300_v23 = vadd.f32 %v643_v24, %v299_v21  ;;  %v364_v25 = vadd.f32 %v643_v24, %v363_v22 }
 0x112   :  { %390 = vst [vmem:[%s776_s3 + $0x78] sm:$0xff] %v308_v19  ;;  %406 = vst [vmem:[%s776_s3 + $0xf8] sm:$0xff] %v372_v20 }
 0x113   :  { %388 = vst [vmem:[%s776_s3 + $0x68] sm:$0xff] %v300_v23  ;;  %404 = vst [vmem:[%s776_s3 + $0xe8] sm:$0xff] %v364_v25 }

// kernel: decoder_forward.7
= control target key start
LH: loop header
LB: loop body
LE: loop exit
PB: predicated region body
PF: predicated region fallthrough
CT: control target
= control target key end

     0   :  { %s555_s12 = smov 0   ;;  %s557_s13 = smov 0   ;;  %s628_s0 = inlined_call_operand.vmem [shape: f32[2,16,16,128], index: 0, kind: input, shape index: {}]   ;;  %s629_s1 = inlined_call_operand.vmem [shape: f32[1,128], index: 1, kind: input, shape index: {}]   ;;  %s630_s2 = inlined_call_operand.vmem [shape: f32[1,128], index: 2, kind: input, shape index: {}]   ;;  %s631_s3 = inlined_call_operand.vmem [shape: bf16[2,18,18,128], index: 3, kind: output, shape index: {}]  }
   0x1   :  { %s559_s14 = smov 0   ;;  %s561_s15 = smov 0  }
   0x2   :  { %s563_s16 = smov 0  }
   0x3 LB: > { %s22_s17 = sadd.s32 1, %s524_s14  ;;  %s25_s18 = sadd.s32 1, %s528_s15  ;;  %s532_s16 = sphi %s563_s16, %s13_s16   ;;  %s528_s15 = sphi %s561_s15, %s635_s15   ;;  %s524_s14 = sphi %s559_s14, %s634_s14   ;;  %s520_s13 = sphi %s557_s13, %s633_s13   ;;  %s516_s12 = sphi %s555_s12, %s632_s12  }
   0x4   : > { %p23_p0 = scmp.ge.s32.totalorder %s22_s17, 18  ;;  %p426_p1 = scmp.ge.s32.totalorder %s532_s16, 1 }
   0x5   : > { %p177_p2 = scmp.lt.s32.totalorder %s532_s16, 37 }
   0x6   : > { %s637_s17 = smov (%p23_p0, %s22_s17), 0  ;;  %s639_s18 = smov (!%p23_p0, %s25_s18), %s528_s15 }
   0x7   : > { %p178_p3 = pnand %p426_p1, %p177_p2  ;;  %p27_p4 = scmp.ge.s32.totalorder %s639_s18, 2 }
   0x8   : > { %s427_s19 = sadd.s32 (!%p178_p3), 4294967295, %s516_s12  ;;  %p219_p5 = scmp.lt.s32.totalorder (!%p178_p3), %s520_s13, 1  ;;  %v534_v0 = vmov (!%p178_p3), 0  }
   0x9   : > { %s641_s18 = smov (%p27_p4, %s639_s18), 0  ;;  %181 = sbr.rel (%p178_p3) target bundleno = 44 (0x2c), region = 32 }
   0xa   : > { %p215_p6 = scmp.gt.s32.totalorder (!%p178_p3), %s427_s19, 0  ;;  %p428_p7 = scmp.lt.s32.totalorder (!%p178_p3), %s427_s19, 15 }
   0xb   : > { %p235_p8 = scmp.lt.s32.totalorder (!%p178_p3), %s516_s12, 17  ;;  %p246_p10 = scmp.gt.s32.totalorder (!%p178_p3), %s516_s12, 0 }
   0xd   : > { %p248_p11 = pnand (!%p178_p3), %p246_p10, %p235_p8 }
  0x10   : > { %s643_s13 = smov (!%p219_p5, %s520_s13), 1  ;;  %s645_s19 = smov (!%p215_p6, %s427_s19), 0 }
  0x11   : > { %s434_s20 = sshll.u32 %s643_s13, 5  ;;  %s647_s19 = smov (!%p428_p7, %s645_s19), 15  ;;  %v437_v2 = vld [vmem:[%s629_s1] ss:$0 sm:$0xff] (!%p248_p11)  ;;  %vm303_vm0 = vcmask (!%p248_p11), 1043456   ;;  %vm310_vm4 = vcmask (!%p248_p11), 1040384  }
  0x12   : > { %s236_s21 = scalar_select %p235_p8, %s516_s12, 17 }
  0x13   : > { %p221_p9 = scmp.lt.s32.totalorder %s647_s19, 15  ;;  %s452_s22 = smul.u32 54, %s643_s13  ;;  %v438_v3 = vld [vmem:[%s630_s2] ss:$0 sm:$0xff] (!%p248_p11)  ;;  %vm304_vm1 = vsmask.f32 (!%p248_p11), 7938 }
  0x14   : > { %s451_s23 = smul.u32 3, %s236_s21  ;;  %vm280_vm2 = vsmask.f32 (!%p248_p11), 256  ;;  %vm281_vm3 = vsmask.f32 (!%p248_p11), 4368  ;;  %vm305_vm5 = vmand (!%p248_p11), %vm303_vm0, %vm304_vm1 }
  0x15   : > { %s649_s19 = smov (!%p221_p9, %s647_s19), 15  ;;  %251 = sbr.rel (%p248_p11) target bundleno = 44 (0x2c), region = 36 }
  0x16   : > { %s239_s24 = sadd.s32 %s452_s22, %s451_s23  ;;  %s433_s25 = sshll.u32 %s649_s19, 1  ;;  %vm282_vm6 = vmor (!%p248_p11), %vm280_vm2, %vm281_vm3 }
  0x17   : > { %s436_s26 = sshll.u32 %s239_s24, 2  ;;  %s225_s27 = sadd.s32 %s434_s20, %s433_s25  ;;  %vm311_vm7 = vmand (!%p248_p11), %vm310_vm4, %vm280_vm2 }
  0x18   : > { %s594_s30 = scalar_lea.vmem %s631_s3, %s436_s26  ;;  %s435_s4 = sshll.u32 %s225_s27, 3 }
  0x19   : > { %243 = vst [vmem:[%s594_s30] sm:$0xf] %v534_v0  ;;  %244 = vst [vmem:[%s594_s30 + $0x4] sm:$0xf] %v534_v0  ;;  %s227_s7 = scalar_lea.vmem %s628_s0, %s435_s4 }
  0x1a   : > { %245 = vst [vmem:[%s594_s30 + $0x8] sm:$0x1] %v534_v0  ;;  %v252_v1 = vld [vmem:[%s227_s7] sm:$0xff] (!%p248_p11)  ;;  %v253_v5 = vld [vmem:[%s227_s7 + $0x8] sm:$0xff] (!%p248_p11) }
  0x1b   : > { %v261_v4 = vmul.f32 (!%p248_p11), %v437_v2, %v252_v1  ;;  %v262_v6 = vmul.f32 (!%p248_p11), %v437_v2, %v253_v5 }
  0x1d   : > { %v270_v7 = vadd.f32 %v438_v3, %v261_v4  ;;  %v271_v8 = vadd.f32 %v438_v3, %v262_v6 }
  0x1f   : > { %v272_v9 = vmax.f32 %v270_v7, 0.0  ;;  %v273_v10 = vmax.f32 %v271_v8, 0.0 }
  0x20   : > { %v306_v18 = vld [vmem:[%s594_s30] sm:$0xf] }
  0x21   : > { %v449_v11 = vpack.c.bf16 %v272_v9, %v272_v9  ;;  %v450_v12 = vpack.c.bf16 %v273_v10, %v273_v10  ;;  %v312_v22 = vld [vmem:[%s594_s30 + $0x8] sm:$0x1] }
  0x23   : > { %v284_v13 = vshrl.u32 %v449_v11, 16  ;;  %v287_v14 = vshll.u32 %v449_v11, 16  ;;  %v292_v15 = vshrl.u32 %v450_v12, 16  ;;  %v295_v16 = vshll.u32 %v450_v12, 16 }
  0x25   : > { %v286_v17 = vrot.slane %v284_v13, 7  ;;  %v294_v19 = vrot.slane %v292_v15, 7 }
  0x27   : > { %v289_v20 = vor.u32 %v287_v14, %v286_v17  ;;  %v290_v21 = vrot.slane %v286_v17, 4  ;;  %v297_v23 = vor.u32 %v295_v16, %v294_v19  ;;  %v299_v24 = vrot.slane %v294_v19, 4 }
  0x29   : > { %v307_v25 = vsel %vm305_vm5, %v289_v20, %v306_v18  ;;  %v298_v26 = vsel %vm282_vm6, %v290_v21, %v297_v23  ;;  %v313_v27 = vsel %vm311_vm7, %v299_v24, %v312_v22 }
  0x2a   : > { %308 = vst [vmem:[%s594_s30] sm:$0xf] %v307_v25  ;;  %309 = vst [vmem:[%s594_s30 + $0x4] sm:$0xf] %v298_v26 }
  0x2b   : > { %314 = vst [vmem:[%s594_s30 + $0x8] sm:$0x1] %v313_v27 }
  0x2c PF: > { %s13_s16 = sadd.s32 1, %s532_s16   ;;  %s632_s12 = smov %s524_s14 }
  0x2d   : > { %p10_p12 = scmp.ge.s32.totalorder %s13_s16, 38   ;;  %s633_s13 = smov %s528_s15 }
  0x2e   : > { %s634_s14 = smov %s637_s17  ;;  %s635_s15 = smov %s641_s18 }
  0x2f   :  { %12 = sbr.rel (!%p10_p12) target bundleno = 3 (0x3), region = 66 }

// kernel: decoder_forward.9
= control target key start
LH: loop header
LB: loop body
LE: loop exit
PB: predicated region body
PF: predicated region fallthrough
CT: control target
= control target key end

     0   :  { %s511_s12 = smov 0   ;;  %s513_s13 = smov 0   ;;  %s574_s0 = inlined_call_operand.vmem [shape: f32[2,16,16,128], index: 0, kind: input, shape index: {}]   ;;  %s575_s1 = inlined_call_operand.vmem [shape: f32[1,128], index: 1, kind: input, shape index: {}]   ;;  %s576_s2 = inlined_call_operand.vmem [shape: f32[1,128], index: 2, kind: input, shape index: {}]   ;;  %s577_s3 = inlined_call_operand.vmem [shape: f32[2,18,18,128], index: 3, kind: output, shape index: {}]  }
   0x1   :  { %s515_s14 = smov 0   ;;  %s517_s15 = smov 0  }
   0x2   :  { %s519_s16 = smov 0  }
   0x3 LB: > { %s22_s17 = sadd.s32 1, %s480_s14  ;;  %s25_s18 = sadd.s32 1, %s484_s15  ;;  %s488_s16 = sphi %s519_s16, %s13_s16   ;;  %s484_s15 = sphi %s517_s15, %s581_s15   ;;  %s480_s14 = sphi %s515_s14, %s580_s14   ;;  %s476_s13 = sphi %s513_s13, %s579_s13   ;;  %s472_s12 = sphi %s511_s12, %s578_s12  }
   0x4   : > { %p23_p0 = scmp.ge.s32.totalorder %s22_s17, 18  ;;  %p386_p1 = scmp.ge.s32.totalorder %s488_s16, 1 }
   0x5   : > { %p177_p2 = scmp.lt.s32.totalorder %s488_s16, 37 }
   0x6   : > { %s583_s17 = smov (%p23_p0, %s22_s17), 0  ;;  %s585_s18 = smov (!%p23_p0, %s25_s18), %s484_s15 }
   0x7   : > { %p178_p3 = pnand %p386_p1, %p177_p2  ;;  %p27_p4 = scmp.ge.s32.totalorder %s585_s18, 2 }
   0x8   : > { %s387_s19 = sadd.s32 (!%p178_p3), 4294967295, %s472_s12  ;;  %p219_p5 = scmp.lt.s32.totalorder (!%p178_p3), %s476_s13, 1  ;;  %v490_v0 = vmov (!%p178_p3), 0.0  }
   0x9   : > { %s587_s18 = smov (%p27_p4, %s585_s18), 0  ;;  %181 = sbr.rel (%p178_p3) target bundleno = 34 (0x22), region = 32 }
   0xa   : > { %p215_p6 = scmp.gt.s32.totalorder (!%p178_p3), %s387_s19, 0  ;;  %p388_p7 = scmp.lt.s32.totalorder (!%p178_p3), %s387_s19, 15 }
   0xb   : > { %p235_p8 = scmp.lt.s32.totalorder (!%p178_p3), %s472_s12, 17  ;;  %p245_p10 = scmp.gt.s32.totalorder (!%p178_p3), %s472_s12, 0 }
   0xd   : > { %p247_p11 = pnand (!%p178_p3), %p245_p10, %p235_p8 }
  0x10   : > { %s589_s13 = smov (!%p219_p5, %s476_s13), 1  ;;  %s591_s19 = smov (!%p215_p6, %s387_s19), 0 }
  0x11   : > { %s394_s20 = sshll.u32 %s589_s13, 5  ;;  %s593_s19 = smov (!%p388_p7, %s591_s19), 15  ;;  %v397_v2 = vld [vmem:[%s575_s1] ss:$0 sm:$0xff] (!%p247_p11) }
  0x12   : > { %s236_s21 = scalar_select %p235_p8, %s472_s12, 17 }
  0x13   : > { %p221_p9 = scmp.lt.s32.totalorder %s593_s19, 15  ;;  %s408_s22 = smul.u32 54, %s589_s13  ;;  %v398_v3 = vld [vmem:[%s576_s2] ss:$0 sm:$0xff] (!%p247_p11) }
  0x14   : > { %s407_s23 = smul.u32 3, %s236_s21 }
  0x15   : > { %s595_s19 = smov (!%p221_p9, %s593_s19), 15  ;;  %250 = sbr.rel (%p247_p11) target bundleno = 34 (0x22), region = 36 }
  0x16   : > { %s239_s24 = sadd.s32 %s408_s22, %s407_s23  ;;  %s393_s25 = sshll.u32 %s595_s19, 1 }
  0x17   : > { %s396_s26 = sshll.u32 %s239_s24, 3  ;;  %s225_s27 = sadd.s32 %s394_s20, %s393_s25 }
  0x18   : > { %s241_s30 = scalar_lea.vmem %s577_s3, %s396_s26  ;;  %s395_s4 = sshll.u32 %s225_s27, 3 }
  0x19   : > { %242 = vst [vmem:[%s241_s30] sm:$0xff] %v490_v0  ;;  %243 = vst [vmem:[%s241_s30 + $0x8] sm:$0xff] %v490_v0  ;;  %s227_s7 = scalar_lea.vmem %s574_s0, %s395_s4 }
  0x1a   : > { %244 = vst [vmem:[%s241_s30 + $0x10] sm:$0x3] %v490_v0  ;;  %v251_v1 = vld [vmem:[%s227_s7] sm:$0xff] (!%p247_p11)  ;;  %v252_v5 = vld [vmem:[%s227_s7 + $0x8] sm:$0xff] (!%p247_p11) }
  0x1b   : > { %v260_v4 = vmul.f32 (!%p247_p11), %v397_v2, %v251_v1  ;;  %v261_v6 = vmul.f32 (!%p247_p11), %v397_v2, %v252_v5 }
  0x1d   : > { %v269_v7 = vadd.f32 %v398_v3, %v260_v4  ;;  %v270_v8 = vadd.f32 %v398_v3, %v261_v6 }
  0x1f   : > { %v271_v9 = vmax.f32 %v269_v7, 0.0  ;;  %v272_v10 = vmax.f32 %v270_v8, 0.0 }
  0x21   : > { %273 = vst [vmem:[%s241_s30 + $0x1] sm:$0xff] %v271_v9  ;;  %274 = vst [vmem:[%s241_s30 + $0x9] sm:$0xff] %v272_v10 }
  0x22 PF: > { %s13_s16 = sadd.s32 1, %s488_s16   ;;  %s578_s12 = smov %s480_s14 }
  0x23   : > { %p10_p12 = scmp.ge.s32.totalorder %s13_s16, 38   ;;  %s579_s13 = smov %s484_s15 }
  0x24   : > { %s580_s14 = smov %s583_s17  ;;  %s581_s15 = smov %s587_s18 }
  0x25   :  { %12 = sbr.rel (!%p10_p12) target bundleno = 3 (0x3), region = 66 }

// kernel: decoder_forward.6
= control target key start
LH: loop header
LB: loop body
LE: loop exit
PB: predicated region body
PF: predicated region fallthrough
CT: control target
= control target key end

     0   :  { %s2462_s24 = smov 0   ;;  %s2464_s25 = smov 0   ;;  %s2902_s0 = inlined_call_operand.vmem [shape: bf16[2,18,18,128], index: 0, kind: input, shape index: {}, may-alias: {0,1,2}]   ;;  %s2903_s1 = inlined_call_operand.vmem [shape: bf16[2,18,18,128], index: 1, kind: input, shape index: {}, may-alias: {0,1,2}]   ;;  %s2904_s2 = inlined_call_operand.vmem [shape: bf16[2,18,18,128], index: 2, kind: input, shape index: {}, may-alias: {0,1,2}]   ;;  %s2905_s3 = inlined_call_operand.vmem [shape: bf16[3,3,128,128], index: 3, kind: input, shape index: {}]   ;;  %s2906_s4 = inlined_call_operand.vmem [shape: f32[1,128], index: 4, kind: input, shape index: {}]   ;;  %s2907_s5 = inlined_call_operand.vmem [shape: f32[2,16,16,128], index: 5, kind: output, shape index: {0}]   ;;  %s2908_s6 = inlined_call_operand.vmem [shape: f32[2,16,1,128], index: 6, kind: output, shape index: {1}]   ;;  %s2909_s7 = inlined_call_operand.vmem [shape: f32[2,16,1,128], index: 7, kind: output, shape index: {2}]  }
   0x1   :  { %s2466_s26 = smov 0   ;;  %s2468_s27 = smov 0  }
   0x2   :  { %s2470_s28 = smov 0  }
   0x3 LB: > { %s27_s29 = sadd.s32 1, %s2410_s26  ;;  %s30_s30 = sadd.s32 1, %s2414_s27  ;;  %s2418_s28 = sphi %s2470_s28, %s18_s28   ;;  %s2414_s27 = sphi %s2468_s27, %s2913_s27   ;;  %s2410_s26 = sphi %s2466_s26, %s2912_s26   ;;  %s2406_s25 = sphi %s2464_s25, %s2911_s25   ;;  %s2402_s24 = sphi %s2462_s24, %s2910_s24  }
   0x4   : > { %p28_p0 = scmp.ge.s32.totalorder %s27_s29, 16  ;;  %p1745_p1 = scmp.ge.s32.totalorder %s2418_s28, 1 }
   0x5   : > { %p306_p2 = scmp.lt.s32.totalorder %s2418_s28, 33 }
   0x6   : > { %s2915_s29 = smov (%p28_p0, %s27_s29), 0  ;;  %s2917_s30 = smov (!%p28_p0, %s30_s30), %s2414_s27 }
   0x7   : > { %p307_p3 = pnand %p1745_p1, %p306_p2  ;;  %p32_p4 = scmp.ge.s32.totalorder %s2917_s30, 2 }
   0x8   : > { %v2302_v0 = vld [vmem:[%s2905_s3] sm:$0xff] (!%p307_p3)   ;;  %v2420_v1 = vmov (!%p307_p3), 0.0   ;;  %v2304_v3 = vld [vmem:[%s2905_s3 + $0x8] sm:$0xff] (!%p307_p3)   ;;  %vm2421_vm0 = vmmov (!%p307_p3), 0   ;;  %p380_p5 = scmp.lt.s32.totalorder (!%p307_p3), %s2406_s25, 1  ;;  %p382_p6 = scmp.lt.s32.totalorder (!%p307_p3), %s2402_s24, 17 }
   0x9   : > { %s2919_s30 = smov (%p32_p4, %s2917_s30), 0  ;;  %310 = sbr.rel (%p307_p3) target bundleno = 404 (0x194), region = 40 }
   0xa   : > { %2044 = vmatprep.subr.bf16.mxu1 (!%p307_p3), %v2420_v1  ;;  %2124 = vmatprep.subr.bf16.mxu0 (!%p307_p3), %v2420_v1  ;;  %v2303_v2 = vld [vmem:[%s2905_s3 + $0x100] sm:$0xff] (!%p307_p3)   ;;  %v2305_v4 = vld [vmem:[%s2905_s3 + $0x108] sm:$0xff] (!%p307_p3)   ;;  %v2306_v5 = vld [vmem:[%s2905_s3 + $0x10] sm:$0xff] (!%p307_p3)   ;;  %s389_s23 = sadd.s32 (!%p307_p3), 1, %s2402_s24  ;;  %vm584_vm1 = vsmask.f32 (!%p307_p3), 7424 }
   0xb   : > { %2045 = vmatpush3.bf16.msra.mxu1 (!%p307_p3), %v2302_v0  ;;  %2060 = vmatprep.mubr.msk.bf16.mxu1 (!%p307_p3), %vm2421_vm0, %v2420_v1  ;;  %v2307_v6 = vld [vmem:[%s2905_s3 + $0x110] sm:$0xff] (!%p307_p3)   ;;  %p392_p7 = scmp.lt.s32.totalorder (!%p307_p3), %s389_s23, 17  ;;  %v2308_v7 = vld [vmem:[%s2905_s3 + $0x18] sm:$0xff] (!%p307_p3)   ;;  %v2310_v9 = vld [vmem:[%s2905_s3 + $0x20] sm:$0xff] (!%p307_p3)   ;;  %s400_s15 = sadd.s32 (!%p307_p3), 2, %s2402_s24  ;;  %vm706_vm2 = vcmask (!%p307_p3), 1046528  }
   0xc   : > { %2125 = vmatpush3.bf16.msra.mxu0 (!%p307_p3), %v2303_v2  ;;  %2046 = vmatprep.subr.bf16.mxu1 (!%p307_p3), %v2420_v1  ;;  %v2309_v8 = vld [vmem:[%s2905_s3 + $0x118] sm:$0xff] (!%p307_p3)   ;;  %v2311_v10 = vld [vmem:[%s2905_s3 + $0x120] sm:$0xff] (!%p307_p3)   ;;  %v2312_v11 = vld [vmem:[%s2905_s3 + $0x28] sm:$0xff] (!%p307_p3)   ;;  %p403_p8 = scmp.lt.s32.totalorder (!%p307_p3), %s400_s15, 17  ;;  %p413_p9 = scmp.lt.s32.totalorder (!%p307_p3), %s2402_s24, 15 }
   0xd   : > { %2126 = vmatprep.subr.bf16.mxu0 (!%p307_p3), %v2420_v1  ;;  %2140 = vmatprep.mubr.msk.bf16.mxu0 (!%p307_p3), %vm2421_vm0, %v2420_v1  ;;  %v2313_v12 = vld [vmem:[%s2905_s3 + $0x128] sm:$0xff] (!%p307_p3)   ;;  %v2314_v15 = vld [vmem:[%s2905_s3 + $0x30] sm:$0xff] (!%p307_p3)   ;;  %v2316_v21 = vld [vmem:[%s2905_s3 + $0x38] sm:$0xff] (!%p307_p3)  }
   0xe   : > { %v2315_v16 = vld [vmem:[%s2905_s3 + $0x130] sm:$0xff] (!%p307_p3)   ;;  %v2317_v22 = vld [vmem:[%s2905_s3 + $0x138] sm:$0xff] (!%p307_p3)   ;;  %v2319_v26 = vld [vmem:[%s2905_s3 + $0x40] sm:$0xff] (!%p307_p3)  }
   0xf   : > { %2047 = vmatpush3.bf16.msra.mxu1 (!%p307_p3), %v2304_v3  ;;  %v2322_v28 = vld [vmem:[%s2905_s3 + $0x140] sm:$0xff] (!%p307_p3)   ;;  %v2323_v29 = vld [vmem:[%s2905_s3 + $0x48] sm:$0xff] (!%p307_p3)   ;;  %v2325_v31 = vld [vmem:[%s2905_s3 + $0x50] sm:$0xff] (!%p307_p3)  }
  0x10   : > { %s2921_s25 = smov (!%p380_p5, %s2406_s25), 1  ;;  %2127 = vmatpush3.bf16.msra.mxu0 %v2305_v4  ;;  %2048 = vmatprep.subr.bf16.mxu1 %v2420_v1  ;;  %s2923_s23 = smov (!%p392_p7, %s389_s23), 17  ;;  %v2324_v30 = vld [vmem:[%s2905_s3 + $0x148] sm:$0xff]   ;;  %v2326_v32 = vld [vmem:[%s2905_s3 + $0x150] sm:$0xff]   ;;  %v2327_v33 = vld [vmem:[%s2905_s3 + $0x58] sm:$0xff]  }
  0x11   : > { %s383_s16 = scalar_select %p382_p6, %s2402_s24, 17  ;;  %2128 = vmatprep.subr.bf16.mxu0 %v2420_v1  ;;  %v2328_v34 = vld [vmem:[%s2905_s3 + $0x158] sm:$0xff]   ;;  %v2329_v35 = vld [vmem:[%s2905_s3 + $0x60] sm:$0xff]   ;;  %v2331_v39 = vld [vmem:[%s2905_s3 + $0x68] sm:$0xff]  }
  0x12   : > { %s2526_s19 = smul.u32 54, %s2921_s25  ;;  %s2925_s15 = smov (!%p403_p8, %s400_s15), 17  ;;  %v2330_v36 = vld [vmem:[%s2905_s3 + $0x160] sm:$0xff]   ;;  %v2332_v40 = vld [vmem:[%s2905_s3 + $0x168] sm:$0xff]   ;;  %v2333_v43 = vld [vmem:[%s2905_s3 + $0x70] sm:$0xff]  }
  0x13   : > { %s2256_s22 = smul.u32 3, %s383_s16  ;;  %2049 = vmatpush3.bf16.msra.mxu1 %v2306_v5  ;;  %v2334_v45 = vld [vmem:[%s2905_s3 + $0x170] sm:$0xff]   ;;  %v2335_v47 = vld [vmem:[%s2905_s3 + $0x78] sm:$0xff]   ;;  %v2338_v54 = vld [vmem:[%s2905_s3 + $0x80] sm:$0xff]   ;;  %s2927_s24 = smov (!%p413_p9, %s2402_s24), 15 }
  0x14   : > { %2129 = vmatpush3.bf16.msra.mxu0 %v2307_v6  ;;  %2050 = vmatprep.subr.bf16.mxu1 %v2420_v1  ;;  %s2258_s16 = smul.u32 3, %s2923_s23  ;;  %v2336_v50 = vld [vmem:[%s2905_s3 + $0x178] sm:$0xff]   ;;  %v2339_v56 = vld [vmem:[%s2905_s3 + $0x180] sm:$0xff]   ;;  %v2340_v58 = vld [vmem:[%s2905_s3 + $0x88] sm:$0xff]   ;;  %s1750_s21 = sshll.u32 %s2921_s25, 5 }
  0x15   : > { %s386_s8 = sadd.s32 %s2526_s19, %s2256_s22  ;;  %2130 = vmatprep.subr.bf16.mxu0 %v2420_v1  ;;  %s2259_s11 = smul.u32 3, %s2925_s15  ;;  %v2341_v59 = vld [vmem:[%s2905_s3 + $0x188] sm:$0xff]   ;;  %v2342_v62 = vld [vmem:[%s2905_s3 + $0x90] sm:$0xff]  }
  0x16   : > { %s1746_s13 = sshll.u32 %s386_s8, 2  ;;  %s396_s8 = sadd.s32 %s2258_s16, %s2526_s19  ;;  %v2343_v2 = vld [vmem:[%s2905_s3 + $0x190] sm:$0xff]  }
  0x17   : > { %2051 = vmatpush3.bf16.msra.mxu1 %v2308_v7  ;;  %s2553_s22 = scalar_lea.vmem %s2902_s0, %s1746_s13  ;;  %s1747_s23 = sshll.u32 %s396_s8, 2  ;;  %v2344_v7 = vld [vmem:[%s2905_s3 + $0x98] sm:$0xff]  }
  0x18   : > { %2131 = vmatpush3.bf16.msra.mxu0 %v2309_v8  ;;  %2052 = vmatprep.subr.bf16.mxu1 %v2420_v1  ;;  %s398_s17 = scalar_lea.vmem %s2903_s1, %s1747_s23  ;;  %v2592_v25 = vld [vmem:[%s2553_s22] sm:$0xff]   ;;  %s407_s16 = sadd.s32 %s2259_s11, %s2526_s19  ;;  %v2643_v37 = vld [vmem:[%s2553_s22 + $0x8] ss:$0 sps:$4 sm:$0x11]  }
  0x19   : > { %2132 = vmatprep.subr.bf16.mxu0 %v2420_v1  ;;  %v2568_v13 = vld [vmem:[%s398_s17] sm:$0xff]   ;;  %v2570_v14 = vld [vmem:[%s398_s17 + $0x8] ss:$0 sps:$4 sm:$0x11]   ;;  %v588_v38 = vshll.u32 %v2592_v25, 16  ;;  %s1748_s20 = sshll.u32 %s407_s16, 2 }
  0x1a   : > { %v937_v17 = vshrl.u32 %v2568_v13, 16  ;;  %v939_v18 = vshll.u32 %v2568_v13, 16  ;;  %v944_v19 = vshll.u32 %v2570_v14, 16  ;;  %s2657_s23 = scalar_lea.vmem %s2904_s2, %s1748_s20  ;;  %v586_v41 = vshrl.u32 %v2592_v25, 16  ;;  %s1749_s20 = sshll.u32 %s2927_s24, 1 }
  0x1b   : > { %2053 = vmatpush3.bf16.msra.mxu1 %v2310_v9  ;;  %v590_v42 = vrot.slane %v588_v38, 1  ;;  %v593_v44 = vshll.u32 %v2643_v37, 16  ;;  %v1057_v46 = vrot.slane %v2568_v13, 1  ;;  %v1058_v51 = vrot.slane %v2570_v14, 1  ;;  %v2680_v52 = vld [vmem:[%s2657_s23] sm:$0xff]   ;;  %v2345_v9 = vld [vmem:[%s2905_s3 + $0x198] sm:$0xff]   ;;  %s417_s8 = sadd.s32 %s1750_s21, %s1749_s20 }
  0x1c   : > { %2133 = vmatpush3.bf16.msra.mxu0 %v2311_v10  ;;  %2054 = vmatprep.subr.bf16.mxu1 %v2420_v1  ;;  %v941_v20 = vrot.slane %v939_v18, 1  ;;  %v946_v24 = vrot.slane %v944_v19, 1  ;;  %v1289_v57 = vshll.u32 %v2680_v52, 16  ;;  %v1287_v60 = vshrl.u32 %v2680_v52, 16  ;;  %v2348_v14 = vld [vmem:[%s2905_s3 + $0xa8] sm:$0xff]   ;;  %v2352_v18 = vld [vmem:[%s2905_s3 + $0xb8] sm:$0xff]  }
  0x1d   : > { %2134 = vmatprep.subr.bf16.mxu0 %v2420_v1  ;;  %v591_v48 = vor.u32 %v590_v42, %v586_v41  ;;  %v595_v49 = vrot.slane %v593_v44, 1  ;;  %v1059_v55 = vsel %vm706_vm2, %v1057_v46, %v1058_v51  ;;  %v2371_v63 = vld [vmem:[%s2657_s23 + $0x8] ss:$0 sps:$4 sm:$0x11]   ;;  %v1407_v0 = vrot.slane %v2680_v52, 1  ;;  %v2370_v38 = vld [vmem:[%s2905_s3 + $0x1f8] sm:$0xff]  }
  0x1e   : > { %v942_v23 = vor.u32 %v941_v20, %v937_v17  ;;  %v1291_v61 = vrot.slane %v1289_v57, 1  ;;  %v1294_v4 = vshll.u32 %v2371_v63, 16  ;;  %v1408_v5 = vrot.slane %v2371_v63, 1  ;;  %v2351_v17 = vld [vmem:[%s2905_s3 + $0x1b0] sm:$0xff]   ;;  %v2376_v42 = vld [vmem:[%s2905_s3 + $0x220] sm:$0xff]   ;;  %s1751_s10 = sshll.u32 %s417_s8, 3 }
  0x1f   : > { %2055 = vmatpush3.bf16.msra.mxu1 %v2312_v11  ;;  %v596_v53 = vsel %vm584_vm1, %v591_v48, %v595_v49  ;;  %v2346_v11 = vld [vmem:[%s2905_s3 + $0xa0] sm:$0xff]   ;;  %v707_v19 = vrot.slane %v2592_v25, 1  ;;  %v708_v20 = vrot.slane %v2643_v37, 1  ;;  %v2369_v37 = vld [vmem:[%s2905_s3 + $0xf8] sm:$0xff]   ;;  %v2374_v41 = vld [vmem:[%s2905_s3 + $0x210] sm:$0xff]   ;;  %s419_s12 = scalar_lea.vmem %s2907_s5, %s1751_s10  ;;  %s1752_s14 = sshll.u32 %s2921_s25, 4 }
  0x20   : > { %2135 = vmatpush3.bf16.msra.mxu0 %v2313_v12  ;;  %2056 = vmatprep.subr.bf16.mxu1 %v2420_v1  ;;  %v947_v27 = vsel %vm584_vm1, %v942_v23, %v946_v24  ;;  %v1292_v3 = vor.u32 %v1291_v61, %v1287_v60  ;;  %v1296_v6 = vrot.slane %v1294_v4, 1  ;;  %v2720_v8 = vsel %vm706_vm2, %v1407_v0, %v1408_v5  ;;  %v2347_v12 = vld [vmem:[%s2905_s3 + $0x1a0] sm:$0xff]   ;;  %v2378_v44 = vld [vmem:[%s2905_s3 + $0x230] sm:$0xff]   ;;  %s425_s17 = sadd.s32 %s1752_s14, %s2927_s24 }
  0x21   : > { %2136 = vmatprep.subr.bf16.mxu0 %v2420_v1  ;;  %v2354_v23 = vld [vmem:[%s2905_s3 + $0xc0] sm:$0xff]   ;;  %s426_s18 = scalar_lea.vmem %s2908_s6, %s425_s17  ;;  %s433_s20 = scalar_lea.vmem %s2909_s7, %s425_s17 }
  0x22   : > { %v2727_v10 = vsel %vm584_vm1, %v1292_v3, %v1296_v6  ;;  %v2356_v24 = vld [vmem:[%s2905_s3 + $0x1c0] sm:$0xff]  }
  0x23   : > { %2057 = vmatpush3.bf16.msra.mxu1 %v2314_v15  ;;  %v2349_v15 = vld [vmem:[%s2905_s3 + $0x1a8] sm:$0xff]  }
  0x24   : > { %2137 = vmatpush3.bf16.msra.mxu0 %v2315_v16  ;;  %2058 = vmatprep.subr.bf16.mxu1 %v2420_v1  ;;  %v2350_v16 = vld [vmem:[%s2905_s3 + $0xb0] sm:$0xff]  }
  0x25   : > { %2138 = vmatprep.subr.bf16.mxu0 %v2420_v1 }
  0x27   : > { %2059 = vmatpush3.bf16.msra.mxu1 %v2316_v21  ;;  %v2353_v21 = vld [vmem:[%s2905_s3 + $0x1b8] sm:$0xff]  }
  0x28   : > { %2139 = vmatpush3.bf16.msra.mxu0 %v2317_v22  ;;  %2064 = vmatprep.subr.bf16.mxu1 %v2420_v1  ;;  %v709_v22 = vsel %vm706_vm2, %v707_v19, %v708_v20 }
  0x29   : > { %2144 = vmatprep.subr.bf16.mxu0 %v2420_v1 }
  0x2a   : > { %2061 = vmatmul.mubr.bf16.vlgmr.msra.gmra.mrb[0].mxu1 %v2592_v25  ;;  %v2357_v25 = vld [vmem:[%s2905_s3 + $0xc8] sm:$0xff]  }
  0x2b   : > { %2065 = vmatpush3.bf16.msra.mxu1 %v2319_v26  ;;  %2141 = vmatmul.mubr.bf16.vlgmr.msra.gmra.mrb[0].mxu0 %v947_v27  ;;  %v2358_v26 = vld [vmem:[%s2905_s3 + $0x1c8] sm:$0xff]   ;;  %v2359_v27 = vld [vmem:[%s2905_s3 + $0xd0] sm:$0xff]  }
  0x2c   : > { %2145 = vmatpush3.bf16.msra.mxu0 %v2322_v28  ;;  %2066 = vmatprep.subr.bf16.mxu1 %v2420_v1  ;;  %v2360_v28 = vld [vmem:[%s2905_s3 + $0x1d0] sm:$0xff]  }
  0x2d   : > { %2146 = vmatprep.subr.bf16.mxu0 %v2420_v1  ;;  %2080 = vmatprep.mubr.msk.bf16.mxu1 %vm2421_vm0, %v2420_v1 }
  0x2e   : > { %2160 = vmatprep.mubr.msk.bf16.mxu0 %vm2421_vm0, %v2420_v1 }
  0x2f   : > { %2067 = vmatpush3.bf16.msra.mxu1 %v2323_v29  ;;  %v2361_v29 = vld [vmem:[%s2905_s3 + $0xd8] sm:$0xff]  }
  0x30   : > { %2147 = vmatpush3.bf16.msra.mxu0 %v2324_v30  ;;  %2068 = vmatprep.subr.bf16.mxu1 %v2420_v1  ;;  %v2362_v30 = vld [vmem:[%s2905_s3 + $0x1d8] sm:$0xff]  }
  0x31   : > { %2148 = vmatprep.subr.bf16.mxu0 %v2420_v1 }
  0x33   : > { %2069 = vmatpush3.bf16.msra.mxu1 %v2325_v31  ;;  %v2363_v31 = vld [vmem:[%s2905_s3 + $0xe0] sm:$0xff]  }
  0x34   : > { %2149 = vmatpush3.bf16.msra.mxu0 %v2326_v32  ;;  %2070 = vmatprep.subr.bf16.mxu1 %v2420_v1  ;;  %v2364_v32 = vld [vmem:[%s2905_s3 + $0x1e0] sm:$0xff]  }
  0x35   : > { %2150 = vmatprep.subr.bf16.mxu0 %v2420_v1 }
  0x37   : > { %2071 = vmatpush3.bf16.msra.mxu1 %v2327_v33  ;;  %v2365_v33 = vld [vmem:[%s2905_s3 + $0xe8] sm:$0xff]  }
  0x38   : > { %2151 = vmatpush3.bf16.msra.mxu0 %v2328_v34  ;;  %2072 = vmatprep.subr.bf16.mxu1 %v2420_v1  ;;  %v2366_v34 = vld [vmem:[%s2905_s3 + $0x1e8] sm:$0xff]  }
  0x39   : > { %2152 = vmatprep.subr.bf16.mxu0 %v2420_v1 }
  0x3b   : > { %2073 = vmatpush3.bf16.msra.mxu1 %v2329_v35  ;;  %v2367_v35 = vld [vmem:[%s2905_s3 + $0xf0] sm:$0xff]  }
  0x3c   : > { %2153 = vmatpush3.bf16.msra.mxu0 %v2330_v36  ;;  %2074 = vmatprep.subr.bf16.mxu1 %v2420_v1  ;;  %v2368_v36 = vld [vmem:[%s2905_s3 + $0x1f0] sm:$0xff]  }
  0x3d   : > { %2154 = vmatprep.subr.bf16.mxu0 %v2420_v1 }
  0x3f   : > { %2075 = vmatpush3.bf16.msra.mxu1 %v2331_v39  ;;  %v2372_v39 = vld [vmem:[%s2905_s3 + $0x200] sm:$0xff]  }
  0x40   : > { %2155 = vmatpush3.bf16.msra.mxu0 %v2332_v40  ;;  %2076 = vmatprep.subr.bf16.mxu1 %v2420_v1  ;;  %v2373_v40 = vld [vmem:[%s2905_s3 + $0x208] sm:$0xff]  }
  0x41   : > { %2156 = vmatprep.subr.bf16.mxu0 %v2420_v1 }
  0x43   : > { %2077 = vmatpush3.bf16.msra.mxu1 %v2333_v43  ;;  %v2377_v43 = vld [vmem:[%s2905_s3 + $0x228] sm:$0xff]  }
  0x44   : > { %2157 = vmatpush3.bf16.msra.mxu0 %v2334_v45  ;;  %2078 = vmatprep.subr.bf16.mxu1 %v2420_v1  ;;  %v2379_v45 = vld [vmem:[%s2905_s3 + $0x238] sm:$0xff]  }
  0x45   : > { %2158 = vmatprep.subr.bf16.mxu0 %v2420_v1 }
  0x47   : > { %2079 = vmatpush3.bf16.msra.mxu1 %v2335_v47 }
  0x48   : > { %2159 = vmatpush3.bf16.msra.mxu0 %v2336_v50  ;;  %2084 = vmatprep.subr.bf16.mxu1 %v2420_v1  ;;  %v1754_v50 = vld [vmem:[%s2906_s4] ss:$0 sm:$0xff] }
  0x49   : > { %2164 = vmatprep.subr.bf16.mxu0 %v2420_v1 }
  0x4a   : > { %2081 = vmatmul.mubr.bf16.vlgmr.msra.gmra.mrb[0].mxu1 %v596_v53 }
  0x4b   : > { %2085 = vmatpush3.bf16.msra.mxu1 %v2338_v54  ;;  %2161 = vmatmul.mubr.bf16.vlgmr.msra.gmra.mrb[0].mxu0 %v1059_v55 }
  0x4c   : > { %2165 = vmatpush3.bf16.msra.mxu0 %v2339_v56  ;;  %2086 = vmatprep.subr.bf16.mxu1 %v2420_v1 }
  0x4d   : > { %2166 = vmatprep.subr.bf16.mxu0 %v2420_v1  ;;  %2100 = vmatprep.mubr.msk.bf16.mxu1 %vm2421_vm0, %v2420_v1 }
  0x4e   : > { %2180 = vmatprep.mubr.msk.bf16.mxu0 %vm2421_vm0, %v2420_v1 }
  0x4f   : > { %2087 = vmatpush3.bf16.msra.mxu1 %v2340_v58 }
  0x50   : > { %2167 = vmatpush3.bf16.msra.mxu0 %v2341_v59  ;;  %2088 = vmatprep.subr.bf16.mxu1 %v2420_v1 }
  0x51   : > { %2168 = vmatprep.subr.bf16.mxu0 %v2420_v1 }
  0x53   : > { %2089 = vmatpush3.bf16.msra.mxu1 %v2342_v62 }
  0x54   : > { %2169 = vmatpush3.bf16.msra.mxu0 %v2343_v2  ;;  %2090 = vmatprep.subr.bf16.mxu1 %v2420_v1 }
  0x55   : > { %2170 = vmatprep.subr.bf16.mxu0 %v2420_v1 }
  0x57   : > { %2091 = vmatpush3.bf16.msra.mxu1 %v2344_v7 }
  0x58   : > { %2171 = vmatpush3.bf16.msra.mxu0 %v2345_v9  ;;  %2092 = vmatprep.subr.bf16.mxu1 %v2420_v1 }
  0x59   : > { %2172 = vmatprep.subr.bf16.mxu0 %v2420_v1 }
  0x5b   : > { %2093 = vmatpush3.bf16.msra.mxu1 %v2346_v11 }
  0x5c   : > { %2173 = vmatpush3.bf16.msra.mxu0 %v2347_v12  ;;  %2094 = vmatprep.subr.bf16.mxu1 %v2420_v1 }
  0x5d   : > { %2174 = vmatprep.subr.bf16.mxu0 %v2420_v1 }
  0x5f   : > { %2095 = vmatpush3.bf16.msra.mxu1 %v2348_v14 }
  0x60   : > { %2175 = vmatpush3.bf16.msra.mxu0 %v2349_v15  ;;  %2096 = vmatprep.subr.bf16.mxu1 %v2420_v1 }
  0x61   : > { %2176 = vmatprep.subr.bf16.mxu0 %v2420_v1 }
  0x63   : > { %2097 = vmatpush3.bf16.msra.mxu1 %v2350_v16 }
  0x64   : > { %2177 = vmatpush3.bf16.msra.mxu0 %v2351_v17  ;;  %2098 = vmatprep.subr.bf16.mxu1 %v2420_v1 }
  0x65   : > { %2178 = vmatprep.subr.bf16.mxu0 %v2420_v1 }
  0x67   : > { %2099 = vmatpush3.bf16.msra.mxu1 %v2352_v18 }
  0x68   : > { %2179 = vmatpush3.bf16.msra.mxu0 %v2353_v21  ;;  %2104 = vmatprep.subr.bf16.mxu1 %v2420_v1 }
  0x69   : > { %2184 = vmatprep.subr.bf16.mxu0 %v2420_v1 }
  0x6a   : > { %2101 = vmatmul.mubr.bf16.vlgmr.msra.gmra.mrb[0].mxu1 %v709_v22 }
  0x6b   : > { %2105 = vmatpush3.bf16.msra.mxu1 %v2354_v23  ;;  %2181 = vmatmul.mubr.bf16.vlgmr.msra.gmra.mrb[0].mxu0 %v2680_v52 }
  0x6c   : > { %2185 = vmatpush3.bf16.msra.mxu0 %v2356_v24  ;;  %2106 = vmatprep.subr.bf16.mxu1 %v2420_v1 }
  0x6d   : > { %2186 = vmatprep.subr.bf16.mxu0 %v2420_v1  ;;  %2120 = vmatprep.mubr.msk.bf16.mxu1 %vm2421_vm0, %v2420_v1 }
  0x6e   : > { %2200 = vmatprep.mubr.msk.bf16.mxu0 %vm2421_vm0, %v2420_v1 }
  0x6f   : > { %2107 = vmatpush3.bf16.msra.mxu1 %v2357_v25 }
  0x70   : > { %2187 = vmatpush3.bf16.msra.mxu0 %v2358_v26  ;;  %2108 = vmatprep.subr.bf16.mxu1 %v2420_v1 }
  0x71   : > { %2188 = vmatprep.subr.bf16.mxu0 %v2420_v1 }
  0x73   : > { %2109 = vmatpush3.bf16.msra.mxu1 %v2359_v27 }
  0x74   : > { %2189 = vmatpush3.bf16.msra.mxu0 %v2360_v28  ;;  %2110 = vmatprep.subr.bf16.mxu1 %v2420_v1 }
  0x75   : > { %2190 = vmatprep.subr.bf16.mxu0 %v2420_v1 }
  0x77   : > { %2111 = vmatpush3.bf16.msra.mxu1 %v2361_v29 }
  0x78   : > { %2191 = vmatpush3.bf16.msra.mxu0 %v2362_v30  ;;  %2112 = vmatprep.subr.bf16.mxu1 %v2420_v1 }
  0x79   : > { %2192 = vmatprep.subr.bf16.mxu0 %v2420_v1 }
  0x7b   : > { %2113 = vmatpush3.bf16.msra.mxu1 %v2363_v31 }
  0x7c   : > { %2193 = vmatpush3.bf16.msra.mxu0 %v2364_v32  ;;  %2114 = vmatprep.subr.bf16.mxu1 %v2420_v1 }
  0x7d   : > { %2194 = vmatprep.subr.bf16.mxu0 %v2420_v1 }
  0x7f   : > { %2115 = vmatpush3.bf16.msra.mxu1 %v2365_v33 }
  0x80   : > { %2195 = vmatpush3.bf16.msra.mxu0 %v2366_v34  ;;  %2116 = vmatprep.subr.bf16.mxu1 %v2420_v1 }
  0x81   : > { %2196 = vmatprep.subr.bf16.mxu0 %v2420_v1 }
  0x83   : > { %2117 = vmatpush3.bf16.msra.mxu1 %v2367_v35 }
  0x84   : > { %2197 = vmatpush3.bf16.msra.mxu0 %v2368_v36  ;;  %2118 = vmatprep.subr.bf16.mxu1 %v2420_v1 }
  0x85   : > { %2198 = vmatprep.subr.bf16.mxu0 %v2420_v1 }
  0x87   : > { %2119 = vmatpush3.bf16.msra.mxu1 %v2369_v37 }
  0x88   : > { %2199 = vmatpush3.bf16.msra.mxu0 %v2370_v38 }
  0x89   : > { %2204 = vmatprep.subr.bf16.mxu0 %v2420_v1 }
  0x8a   : > { %2121 = vmatmul.mubr.bf16.vlgmr.msra.gmra.mrb[0].mxu1 %v2568_v13  ;;  %v2375_v13 = vld [vmem:[%s2905_s3 + $0x218] sm:$0xff]  }
  0x8b   : > { %2201 = vmatmul.mubr.bf16.vlgmr.msra.gmra.mrb[0].mxu0 %v2727_v10 }
  0x8c   : > { %2205 = vmatpush3.bf16.msra.mxu0 %v2372_v39  ;;  %2220 = vmatprep.mubr.msk.bf16.mxu0 %vm2421_vm0, %v2420_v1 }
  0x8d   : > { %2206 = vmatprep.subr.bf16.mxu0 %v2420_v1 }
  0x90   : > { %2207 = vmatpush3.bf16.msra.mxu0 %v2373_v40 }
  0x91   : > { %2208 = vmatprep.subr.bf16.mxu0 %v2420_v1 }
  0x94   : > { %2209 = vmatpush3.bf16.msra.mxu0 %v2374_v41 }
  0x95   : > { %2210 = vmatprep.subr.bf16.mxu0 %v2420_v1 }
  0x98   : > { %2211 = vmatpush3.bf16.msra.mxu0 %v2375_v13 }
  0x99   : > { %2212 = vmatprep.subr.bf16.mxu0 %v2420_v1 }
  0x9c   : > { %2213 = vmatpush3.bf16.msra.mxu0 %v2376_v42 }
  0x9d   : > { %2214 = vmatprep.subr.bf16.mxu0 %v2420_v1 }
  0xa0   : > { %2215 = vmatpush3.bf16.msra.mxu0 %v2377_v43 }
  0xa1   : > { %2216 = vmatprep.subr.bf16.mxu0 %v2420_v1 }
  0xa4   : > { %2217 = vmatpush3.bf16.msra.mxu0 %v2378_v44 }
  0xa5   : > { %2218 = vmatprep.subr.bf16.mxu0 %v2420_v1 }
  0xa8   : > { %2219 = vmatpush3.bf16.msra.mxu0 %v2379_v45 }
  0xab   : > { %2221 = vmatmul.mubr.bf16.vlgmr.msra.gmra.mrb[0].mxu0 %v2720_v8 }
 0x15d   : > { %v907_v46 = vpop.f32.mrb[0].mxu1 }
 0x15e   : > { %v2122_v47 = vpop.f32.mrb[1].mxu1  ;;  %v2224_v51 = vadd.f32 %v1754_v50, %v907_v46 }
 0x15f   : > { %v910_v48 = vpop.f32.mrb[2].mxu1 }
 0x160   : > { %v2123_v49 = vpop.f32.mrb[3].mxu1  ;;  %v2226_v52 = vadd.f32 %v1754_v50, %v910_v48 }
 0x17e   : > { %v1493_v1 = vpop.f32.mrb[0].mxu0 }
 0x17f   : > { %v2225_v53 = vadd.f32 %v2224_v51, %v1493_v1  ;;  %v2222_v54 = vpop.f32.mrb[1].mxu0 }
 0x180   : > { %v1496_v55 = vpop.f32.mrb[2].mxu0 }
 0x181   : > { %1502 = vst [vmem:[%s419_s12] sm:$0xff] %v2225_v53  ;;  %v2227_v56 = vadd.f32 %v2226_v52, %v1496_v55  ;;  %v2223_v57 = vpop.f32.mrb[3].mxu0  ;;  %v1512_v58 = vmul.f32 %v2225_v53, %v2225_v53 }
 0x183   : > { %1503 = vst [vmem:[%s419_s12 + $0x8] sm:$0xff] %v2227_v56  ;;  %v1504_v59 = vadd.f32 %v2227_v56, %v2225_v53  ;;  %v1513_v60 = vmul.f32 %v2227_v56, %v2227_v56 }
 0x185   : > { %v1505_v61 = vrot.slane %v1504_v59, 4  ;;  %v1514_v62 = vadd.f32 %v1513_v60, %v1512_v58 }
 0x187   : > { %v1506_v63 = vadd.f32 %v1505_v61, %v1504_v59  ;;  %v1515_v0 = vrot.slane %v1514_v62, 4 }
 0x189   : > { %v1507_v2 = vrot.slane %v1506_v63, 2  ;;  %v1516_v3 = vadd.f32 %v1515_v0, %v1514_v62 }
 0x18b   : > { %v1508_v4 = vadd.f32 %v1507_v2, %v1506_v63  ;;  %v1517_v5 = vrot.slane %v1516_v3, 2 }
 0x18d   : > { %v1509_v6 = vrot.slane %v1508_v4, 1  ;;  %v1518_v7 = vadd.f32 %v1517_v5, %v1516_v3 }
 0x18f   : > { %v1510_v8 = vadd.f32 %v1509_v6, %v1508_v4  ;;  %v1519_v9 = vrot.slane %v1518_v7, 1 }
 0x191   : > { %1511 = vst [vmem:[%s426_s18] sm:$0x1] %v1510_v8  ;;  %v1520_v10 = vadd.f32 %v1519_v9, %v1518_v7 }
 0x193   : > { %1521 = vst [vmem:[%s433_s20] sm:$0x1] %v1520_v10 }
 0x194 PF: > { %s18_s28 = sadd.s32 1, %s2418_s28   ;;  %s2910_s24 = smov %s2410_s26 }
 0x195   : > { %p15_p10 = scmp.ge.s32.totalorder %s18_s28, 34   ;;  %s2911_s25 = smov %s2414_s27 }
 0x196   : > { %s2912_s26 = smov %s2915_s29  ;;  %s2913_s27 = smov %s2919_s30 }
 0x197   :  { %17 = sbr.rel (!%p15_p10) target bundleno = 3 (0x3), region = 108 }

</bundles_post_ra>
